<compile_context>
chip_gen: v7x
topology: tpu7x:2x2x1
jax: 0.10.0
libtpu: 0.0.40
codegen_flags: <defaults>
</compile_context>

<pallas_src>
import functools
import math

import jax
import jax.numpy as jnp
from jax.experimental import pallas as pl
from jax.experimental.pallas import tpu as pltpu


def _probsparse_kernel(smask_ref, q_ref, k_ref, v_ref, o_ref, *, L, H, D, u, scale):
    """One batch element: all H heads, q/k/v presented as (1, L, H*D) slabs."""
    neg_inf = jnp.float32(-jnp.inf)
    inv_L = jnp.float32(1.0 / L)
    dims = (((1,), (1,)), ((), ()))  # contract last dims: Q @ K^T

    sm = smask_ref[...] != 0  # (L, L) bool: sm[i, j] = key j sampled for query i

    row = jax.lax.broadcasted_iota(jnp.int32, (L, L), 0)
    col = jax.lax.broadcasted_iota(jnp.int32, (L, L), 1)
    causal = col > row                                        # shared by all heads
    eye = col == row
    tril_f = jnp.where(causal, jnp.float32(0.0), jnp.float32(1.0))  # cumsum weights

    for h in range(H):                      # static unrolled loop, static lane slices
        lo = h * D
        q = q_ref[0, :, lo:lo + D]          # (L, D), input dtype (bf16-capable)
        k = k_ref[0, :, lo:lo + D]
        v = v_ref[0, :, lo:lo + D]

        # Full scores on the MXU, f32 accumulation:  s[i, j] = q_i . k_j
        s = jax.lax.dot_general(q, k, dims, preferred_element_type=jnp.float32)

        # Sparsity measure M[i] = max over sampled keys - (sum over sampled keys) / L_K
        m_col = (jnp.max(jnp.where(sm, s, neg_inf), axis=1, keepdims=True)
                 - jnp.sum(jnp.where(sm, s, jnp.float32(0.0)), axis=1, keepdims=True)
                 * inv_L)                                                     # (L, 1)
        # Lane-indexed copy of M without a transposed matmul: diag-select + sublane max.
        m_row = jnp.max(jnp.where(eye, m_col, neg_inf), axis=0, keepdims=True)  # (1, L)

        # top-u via rank counting: selected[i]  <=>  #{j : M[j] > M[i]} < u
        rank = jnp.sum((m_row > m_col).astype(jnp.float32), axis=1, keepdims=True)
        selected = rank < jnp.float32(u)                                      # (L, 1)

        # ProbMask == causal mask on the gathered rows -> causal masked softmax.
        scores = jnp.where(causal, neg_inf, s * jnp.float32(scale))
        p = jnp.exp(scores - jnp.max(scores, axis=1, keepdims=True))
        denom = jnp.sum(p, axis=1, keepdims=True)                             # (L, 1)
        inv = pl.reciprocal(denom, approx=True)         # EUP slot
        inv = inv * (jnp.float32(2.0) - denom * inv)    # one NR step: keeps f32 accuracy
        attn = p * inv

        # Fused context: selected rows use softmax weights, the rest use lower-triangular
        # (cumsum) weights -> a single (L,L)@(L,D) MXU pass produces the final context.
        w = jnp.where(selected, attn, tril_f).astype(v.dtype)
        ctx = jnp.dot(w, v, preferred_element_type=jnp.float32)               # (L, D)

        # Output block is (L, H*D) lane-dense for the HBM writeback; this is a static
        # lane-sub-slice store into the resident VMEM block.
        o_ref[0, :, lo:lo + D] = ctx.astype(o_ref.dtype)


def build_sample_mask(key, L, sample_k):
    """Host glue: deterministic stand-in for `random.sample` per query row."""
    rows = []
    for i in range(L):
        perm = jax.random.permutation(jax.random.fold_in(key, i), L)
        rows.append(jnp.zeros((L,), jnp.float32).at[perm[:sample_k]].set(1.0))
    return jnp.stack(rows)


def probsparse_attention_pallas(queries, keys, values, smask, u, scale):
    """Mirrors ProbSparse_Attention(mask_flag=True, output_attention=False).forward."""
    B, L_Q, H, D = queries.shape
    _, L_K, _, _ = keys.shape
    assert L_Q == L_K
    L = L_Q
    HD = H * D
    out_dtype = values.dtype

    # Free reshapes (contiguous merge of the two trailing dims): no HBM transpose passes.
    q = queries.reshape(B, L, HD)
    k = keys.reshape(B, L, HD)
    v = values.reshape(B, L, HD)
    smask_i8 = (smask > 0).astype(jnp.int8)

    kernel = functools.partial(_probsparse_kernel, L=L, H=H, D=D, u=u, scale=scale)
    ctx = pl.pallas_call(
        kernel,
        out_shape=jax.ShapeDtypeStruct((B, L, HD), out_dtype),
        grid=(B,),
        in_specs=[
            pl.BlockSpec((L, L), lambda b: (0, 0)),           # smask (int8), fetched once
            pl.BlockSpec((1, L, HD), lambda b: (b, 0, 0)),    # q slab, all heads
            pl.BlockSpec((1, L, HD), lambda b: (b, 0, 0)),    # k slab
            pl.BlockSpec((1, L, HD), lambda b: (b, 0, 0)),    # v slab
        ],
        out_specs=pl.BlockSpec((1, L, HD), lambda b: (b, 0, 0)),  # lane-dense (H*D >= 128)
        compiler_params=pltpu.CompilerParams(
            dimension_semantics=("parallel",),
            vmem_limit_bytes=48 * 1024 * 1024),
    )(smask_i8, q, k, v)

    context = ctx.reshape(B, L, H, D)        # free reshape back to (B, L, H, D)
    return context, None                     # output_attention=False -> attn is None


def probsparse_attention_ref(queries, keys, values, smask, u, scale):
    """Pure-JAX reference with the literal topk + gather + scatter semantics."""
    B, L, H, D = queries.shape
    q = jnp.transpose(queries, (0, 2, 1, 3))
    k = jnp.transpose(keys, (0, 2, 1, 3))
    v = jnp.transpose(values, (0, 2, 1, 3))

    S = jnp.einsum('bhld,bhmd->bhlm', q, k)
    M = (jnp.max(jnp.where(smask[None, None] > 0, S, -jnp.inf), axis=-1)
         - jnp.sum(S * smask[None, None], axis=-1) / L)
    _, index = jax.lax.top_k(M, u)                                 # (B, H, u)

    b_idx = jnp.arange(B)[:, None, None]
    h_idx = jnp.arange(H)[None, :, None]
    q_red = q[b_idx, h_idx, index]                                 # (B, H, u, D)
    scores = jnp.einsum('bhud,bhld->bhul', q_red, k) * scale
    causal = jnp.triu(jnp.ones((L, L), bool), 1)
    scores = jnp.where(causal[index], -jnp.inf, scores)
    attn = jax.nn.softmax(scores, axis=-1)
    upd = jnp.einsum('bhul,bhld->bhud', attn, v)

    ctx = jnp.cumsum(v, axis=2)
    ctx = ctx.at[b_idx, h_idx, index].set(upd)
    return jnp.transpose(ctx, (0, 2, 1, 3)), None


if __name__ == "__main__":
    B, L, H, D = 2, 32, 4, 32
    factor = 5

    key = jax.random.PRNGKey(0)
    kq, kk, kv, ks = jax.random.split(key, 4)
    queries = jax.random.normal(kq, (B, L, H, D), jnp.float32)
    keys = jax.random.normal(kk, (B, L, H, D), jnp.float32)
    values = jax.random.normal(kv, (B, L, H, D), jnp.float32)

    U_part = factor * int(math.ceil(math.log(L)))   # sample_k
    u = factor * int(math.ceil(math.log(L)))        # n_top
    if U_part > L:
        U_part = L
        u = L
    scale = 1.0 / math.sqrt(D)

    smask = build_sample_mask(ks, L, U_part)

    # f32 path (faithful to the torch module's default dtype).
    ctx, attn = probsparse_attention_pallas(queries, keys, values, smask, u, scale)
    ctx = jax.block_until_ready(ctx)

    ctx_ref, _ = probsparse_attention_ref(queries, keys, values, smask, u, scale)
    err = float(jnp.max(jnp.abs(ctx - ctx_ref)))
    # 5e-3 slack covers MXU f32-emulation differences + the EUP approximate reciprocal.
    assert ctx.shape == (B, L, H, D) and attn is None and err < 5e-3, err

    # bf16 smoke run (MXU-native path).  Top-u selection is sensitive to score rounding,
    # so only shape / finiteness are checked against this path.
    ctx16, _ = probsparse_attention_pallas(
        queries.astype(jnp.bfloat16), keys.astype(jnp.bfloat16),
        values.astype(jnp.bfloat16), smask, u, scale)
    ctx16 = jax.block_until_ready(ctx16)
    assert ctx16.shape == (B, L, H, D)
    assert bool(jnp.all(jnp.isfinite(ctx16.astype(jnp.float32))))

    print("KERNEL_OK")
</pallas_src>

<mosaic_0001>
module attributes {stable_mosaic.version = 11 : i64} {
  func.func @_probsparse_kernel(%arg0: i32, %arg1: memref<32x32xi8, #tpu.memory_space<vmem>>, %arg2: memref<1x32x128xf32, #tpu.memory_space<vmem>>, %arg3: memref<1x32x128xf32, #tpu.memory_space<vmem>>, %arg4: memref<1x32x128xf32, #tpu.memory_space<vmem>>, %arg5: memref<1x32x128xf32, #tpu.memory_space<vmem>>) attributes {dimension_semantics = [#tpu.dimension_semantics<parallel>], iteration_bounds = array<i64: 2>, scalar_prefetch = 0 : i64, scratch_operands = 0 : i64, tpu.core_type = #tpu.core_type<tc>, window_params = [{pipeline_mode = #tpu.pipeline_mode<synchronous>, transform_indices = @transform_0, window_bounds = array<i64: 32, 32>}, {transform_indices = @transform_1, window_bounds = array<i64: 1, 32, 128>}, {transform_indices = @transform_2, window_bounds = array<i64: 1, 32, 128>}, {transform_indices = @transform_3, window_bounds = array<i64: 1, 32, 128>}, {transform_indices = @transform_4, window_bounds = array<i64: 1, 32, 128>}]} {
    %c0 = arith.constant 0 : index
    %c0_0 = arith.constant 0 : index
    %0 = vector.load %arg1[%c0, %c0_0] : memref<32x32xi8, #tpu.memory_space<vmem>>, vector<32x32xi8>
    %c0_i8 = arith.constant 0 : i8
    %1 = vector.broadcast %c0_i8 : i8 to vector<32x32xi8>
    %2 = arith.cmpi ne, %0, %1 : vector<32x32xi8>
    %3 = tpu.iota {dimensions = array<i32: 0>} : vector<32x32xi32>
    %4 = tpu.iota {dimensions = array<i32: 1>} : vector<32x32xi32>
    %5 = arith.cmpi sgt, %4, %3 : vector<32x32xi32>
    %6 = arith.cmpi eq, %4, %3 : vector<32x32xi32>
    %cst = arith.constant 0.000000e+00 : f32
    %cst_1 = arith.constant 1.000000e+00 : f32
    %7 = vector.broadcast %cst : f32 to vector<32x32xf32>
    %8 = vector.broadcast %cst_1 : f32 to vector<32x32xf32>
    %9 = arith.select %5, %7, %8 : vector<32x32xi1>, vector<32x32xf32>
    %c0_2 = arith.constant 0 : index
    %c0_3 = arith.constant 0 : index
    %c0_4 = arith.constant 0 : index
    %10 = vector.load %arg2[%c0_2, %c0_3, %c0_4] : memref<1x32x128xf32, #tpu.memory_space<vmem>>, vector<1x32x32xf32>
    %11 = vector.shape_cast %10 : vector<1x32x32xf32> to vector<32x32xf32>
    %c0_5 = arith.constant 0 : index
    %c0_6 = arith.constant 0 : index
    %c0_7 = arith.constant 0 : index
    %12 = vector.load %arg3[%c0_5, %c0_6, %c0_7] : memref<1x32x128xf32, #tpu.memory_space<vmem>>, vector<1x32x32xf32>
    %13 = vector.shape_cast %12 : vector<1x32x32xf32> to vector<32x32xf32>
    %c0_8 = arith.constant 0 : index
    %c0_9 = arith.constant 0 : index
    %c0_10 = arith.constant 0 : index
    %14 = vector.load %arg4[%c0_8, %c0_9, %c0_10] : memref<1x32x128xf32, #tpu.memory_space<vmem>>, vector<1x32x32xf32>
    %15 = vector.shape_cast %14 : vector<1x32x32xf32> to vector<32x32xf32>
    %cst_11 = arith.constant dense<0.000000e+00> : vector<32x32xf32>
    %16 = tpu.matmul %11, %13, %cst_11 {dimension_numbers = #tpu.dot_dimension_numbers<[1], [1], [0], [0], [0, 0, 1, 0], [], []>} : vector<32x32xf32>, vector<32x32xf32>, vector<32x32xf32> -> vector<32x32xf32>
    %cst_12 = arith.constant 0xFF800000 : f32
    %17 = vector.broadcast %cst_12 : f32 to vector<32x32xf32>
    %18 = arith.select %2, %16, %17 : vector<32x32xi1>, vector<32x32xf32>
    %cst_13 = arith.constant dense<0xFF800000> : vector<32xf32>
    %19 = vector.multi_reduction <maximumf>, %18, %cst_13 [1] : vector<32x32xf32> to vector<32xf32>
    %20 = vector.shape_cast %19 : vector<32xf32> to vector<32x1xf32>
    %cst_14 = arith.constant 0.000000e+00 : f32
    %21 = vector.broadcast %cst_14 : f32 to vector<32x32xf32>
    %22 = arith.select %2, %16, %21 : vector<32x32xi1>, vector<32x32xf32>
    %cst_15 = arith.constant dense<0.000000e+00> : vector<32xf32>
    %23 = vector.multi_reduction <add>, %22, %cst_15 [1] : vector<32x32xf32> to vector<32xf32>
    %24 = vector.shape_cast %23 : vector<32xf32> to vector<32x1xf32>
    %cst_16 = arith.constant 3.125000e-02 : f32
    %25 = vector.broadcast %cst_16 : f32 to vector<32x1xf32>
    %26 = arith.mulf %24, %25 : vector<32x1xf32>
    %27 = arith.subf %20, %26 : vector<32x1xf32>
    %cst_17 = arith.constant 0xFF800000 : f32
    %28 = vector.shape_cast %27 : vector<32x1xf32> to vector<32x1xf32>
    %29 = vector.broadcast %28 : vector<32x1xf32> to vector<32x32xf32>
    %30 = vector.broadcast %cst_17 : f32 to vector<32x32xf32>
    %31 = arith.select %6, %29, %30 : vector<32x32xi1>, vector<32x32xf32>
    %cst_18 = arith.constant dense<0xFF800000> : vector<32xf32>
    %32 = vector.multi_reduction <maximumf>, %31, %cst_18 [0] : vector<32x32xf32> to vector<32xf32>
    %33 = vector.shape_cast %32 : vector<32xf32> to vector<1x32xf32>
    %34 = vector.broadcast %33 : vector<1x32xf32> to vector<32x32xf32>
    %35 = vector.broadcast %27 : vector<32x1xf32> to vector<32x32xf32>
    %36 = arith.cmpf ogt, %34, %35 : vector<32x32xf32>
    %37 = arith.extui %36 : vector<32x32xi1> to vector<32x32xi32>
    %38 = arith.sitofp %37 : vector<32x32xi32> to vector<32x32xf32>
    %cst_19 = arith.constant dense<0.000000e+00> : vector<32xf32>
    %39 = vector.multi_reduction <add>, %38, %cst_19 [1] : vector<32x32xf32> to vector<32xf32>
    %40 = vector.shape_cast %39 : vector<32xf32> to vector<32x1xf32>
    %cst_20 = arith.constant 2.000000e+01 : f32
    %41 = vector.broadcast %cst_20 : f32 to vector<32x1xf32>
    %42 = arith.cmpf olt, %40, %41 : vector<32x1xf32>
    %cst_21 = arith.constant 0.176776692 : f32
    %43 = vector.broadcast %cst_21 : f32 to vector<32x32xf32>
    %44 = arith.mulf %16, %43 : vector<32x32xf32>
    %cst_22 = arith.constant 0xFF800000 : f32
    %45 = vector.broadcast %cst_22 : f32 to vector<32x32xf32>
    %46 = arith.select %5, %45, %44 : vector<32x32xi1>, vector<32x32xf32>
    %cst_23 = arith.constant dense<0xFF800000> : vector<32xf32>
    %47 = vector.multi_reduction <maximumf>, %46, %cst_23 [1] : vector<32x32xf32> to vector<32xf32>
    %48 = vector.shape_cast %47 : vector<32xf32> to vector<32x1xf32>
    %49 = vector.broadcast %48 : vector<32x1xf32> to vector<32x32xf32>
    %50 = arith.subf %46, %49 : vector<32x32xf32>
    %51 = math.exp %50 : vector<32x32xf32>
    %cst_24 = arith.constant dense<0.000000e+00> : vector<32xf32>
    %52 = vector.multi_reduction <add>, %51, %cst_24 [1] : vector<32x32xf32> to vector<32xf32>
    %53 = vector.shape_cast %52 : vector<32xf32> to vector<32x1xf32>
    %54 = tpu.reciprocal %53 {approx = true} : vector<32x1xf32> -> vector<32x1xf32>
    %55 = arith.mulf %53, %54 : vector<32x1xf32>
    %cst_25 = arith.constant 2.000000e+00 : f32
    %56 = vector.broadcast %cst_25 : f32 to vector<32x1xf32>
    %57 = arith.subf %56, %55 : vector<32x1xf32>
    %58 = arith.mulf %54, %57 : vector<32x1xf32>
    %59 = vector.broadcast %58 : vector<32x1xf32> to vector<32x32xf32>
    %60 = arith.mulf %51, %59 : vector<32x32xf32>
    %61 = vector.shape_cast %42 : vector<32x1xi1> to vector<32x1xi1>
    %62 = vector.broadcast %61 : vector<32x1xi1> to vector<32x32xi1>
    %63 = arith.select %62, %60, %9 : vector<32x32xi1>, vector<32x32xf32>
    %cst_26 = arith.constant dense<0.000000e+00> : vector<32x32xf32>
    %64 = tpu.matmul %63, %15, %cst_26 {dimension_numbers = #tpu.dot_dimension_numbers<[1], [0], [0], [1], [0, 0, 1, 1], [], []>} : vector<32x32xf32>, vector<32x32xf32>, vector<32x32xf32> -> vector<32x32xf32>
    %c0_27 = arith.constant 0 : index
    %c0_28 = arith.constant 0 : index
    %c0_29 = arith.constant 0 : index
    %65 = vector.load %arg5[%c0_27, %c0_28, %c0_29] : memref<1x32x128xf32, #tpu.memory_space<vmem>>, vector<1x32x32xf32>
    %66 = vector.shape_cast %65 : vector<1x32x32xf32> to vector<32x32xf32>
    %67 = vector.shape_cast %64 : vector<32x32xf32> to vector<1x32x32xf32>
    tpu.vector_store %arg5[%c0_27, %c0_28, %c0_29], %67 {strides = array<i32>} : memref<1x32x128xf32, #tpu.memory_space<vmem>>, vector<1x32x32xf32>,
    %c0_30 = arith.constant 0 : index
    %c0_31 = arith.constant 0 : index
    %c32 = arith.constant 32 : index
    %68 = vector.load %arg2[%c0_30, %c0_31, %c32] : memref<1x32x128xf32, #tpu.memory_space<vmem>>, vector<1x32x32xf32>
    %69 = vector.shape_cast %68 : vector<1x32x32xf32> to vector<32x32xf32>
    %c0_32 = arith.constant 0 : index
    %c0_33 = arith.constant 0 : index
    %c32_34 = arith.constant 32 : index
    %70 = vector.load %arg3[%c0_32, %c0_33, %c32_34] : memref<1x32x128xf32, #tpu.memory_space<vmem>>, vector<1x32x32xf32>
    %71 = vector.shape_cast %70 : vector<1x32x32xf32> to vector<32x32xf32>
    %c0_35 = arith.constant 0 : index
    %c0_36 = arith.constant 0 : index
    %c32_37 = arith.constant 32 : index
    %72 = vector.load %arg4[%c0_35, %c0_36, %c32_37] : memref<1x32x128xf32, #tpu.memory_space<vmem>>, vector<1x32x32xf32>
    %73 = vector.shape_cast %72 : vector<1x32x32xf32> to vector<32x32xf32>
    %cst_38 = arith.constant dense<0.000000e+00> : vector<32x32xf32>
    %74 = tpu.matmul %69, %71, %cst_38 {dimension_numbers = #tpu.dot_dimension_numbers<[1], [1], [0], [0], [0, 0, 1, 0], [], []>} : vector<32x32xf32>, vector<32x32xf32>, vector<32x32xf32> -> vector<32x32xf32>
    %cst_39 = arith.constant 0xFF800000 : f32
    %75 = vector.broadcast %cst_39 : f32 to vector<32x32xf32>
    %76 = arith.select %2, %74, %75 : vector<32x32xi1>, vector<32x32xf32>
    %cst_40 = arith.constant dense<0xFF800000> : vector<32xf32>
    %77 = vector.multi_reduction <maximumf>, %76, %cst_40 [1] : vector<32x32xf32> to vector<32xf32>
    %78 = vector.shape_cast %77 : vector<32xf32> to vector<32x1xf32>
    %cst_41 = arith.constant 0.000000e+00 : f32
    %79 = vector.broadcast %cst_41 : f32 to vector<32x32xf32>
    %80 = arith.select %2, %74, %79 : vector<32x32xi1>, vector<32x32xf32>
    %cst_42 = arith.constant dense<0.000000e+00> : vector<32xf32>
    %81 = vector.multi_reduction <add>, %80, %cst_42 [1] : vector<32x32xf32> to vector<32xf32>
    %82 = vector.shape_cast %81 : vector<32xf32> to vector<32x1xf32>
    %cst_43 = arith.constant 3.125000e-02 : f32
    %83 = vector.broadcast %cst_43 : f32 to vector<32x1xf32>
    %84 = arith.mulf %82, %83 : vector<32x1xf32>
    %85 = arith.subf %78, %84 : vector<32x1xf32>
    %cst_44 = arith.constant 0xFF800000 : f32
    %86 = vector.shape_cast %85 : vector<32x1xf32> to vector<32x1xf32>
    %87 = vector.broadcast %86 : vector<32x1xf32> to vector<32x32xf32>
    %88 = vector.broadcast %cst_44 : f32 to vector<32x32xf32>
    %89 = arith.select %6, %87, %88 : vector<32x32xi1>, vector<32x32xf32>
    %cst_45 = arith.constant dense<0xFF800000> : vector<32xf32>
    %90 = vector.multi_reduction <maximumf>, %89, %cst_45 [0] : vector<32x32xf32> to vector<32xf32>
    %91 = vector.shape_cast %90 : vector<32xf32> to vector<1x32xf32>
    %92 = vector.broadcast %91 : vector<1x32xf32> to vector<32x32xf32>
    %93 = vector.broadcast %85 : vector<32x1xf32> to vector<32x32xf32>
    %94 = arith.cmpf ogt, %92, %93 : vector<32x32xf32>
    %95 = arith.extui %94 : vector<32x32xi1> to vector<32x32xi32>
    %96 = arith.sitofp %95 : vector<32x32xi32> to vector<32x32xf32>
    %cst_46 = arith.constant dense<0.000000e+00> : vector<32xf32>
    %97 = vector.multi_reduction <add>, %96, %cst_46 [1] : vector<32x32xf32> to vector<32xf32>
    %98 = vector.shape_cast %97 : vector<32xf32> to vector<32x1xf32>
    %cst_47 = arith.constant 2.000000e+01 : f32
    %99 = vector.broadcast %cst_47 : f32 to vector<32x1xf32>
    %100 = arith.cmpf olt, %98, %99 : vector<32x1xf32>
    %cst_48 = arith.constant 0.176776692 : f32
    %101 = vector.broadcast %cst_48 : f32 to vector<32x32xf32>
    %102 = arith.mulf %74, %101 : vector<32x32xf32>
    %cst_49 = arith.constant 0xFF800000 : f32
    %103 = vector.broadcast %cst_49 : f32 to vector<32x32xf32>
    %104 = arith.select %5, %103, %102 : vector<32x32xi1>, vector<32x32xf32>
    %cst_50 = arith.constant dense<0xFF800000> : vector<32xf32>
    %105 = vector.multi_reduction <maximumf>, %104, %cst_50 [1] : vector<32x32xf32> to vector<32xf32>
    %106 = vector.shape_cast %105 : vector<32xf32> to vector<32x1xf32>
    %107 = vector.broadcast %106 : vector<32x1xf32> to vector<32x32xf32>
    %108 = arith.subf %104, %107 : vector<32x32xf32>
    %109 = math.exp %108 : vector<32x32xf32>
    %cst_51 = arith.constant dense<0.000000e+00> : vector<32xf32>
    %110 = vector.multi_reduction <add>, %109, %cst_51 [1] : vector<32x32xf32> to vector<32xf32>
    %111 = vector.shape_cast %110 : vector<32xf32> to vector<32x1xf32>
    %112 = tpu.reciprocal %111 {approx = true} : vector<32x1xf32> -> vector<32x1xf32>
    %113 = arith.mulf %111, %112 : vector<32x1xf32>
    %cst_52 = arith.constant 2.000000e+00 : f32
    %114 = vector.broadcast %cst_52 : f32 to vector<32x1xf32>
    %115 = arith.subf %114, %113 : vector<32x1xf32>
    %116 = arith.mulf %112, %115 : vector<32x1xf32>
    %117 = vector.broadcast %116 : vector<32x1xf32> to vector<32x32xf32>
    %118 = arith.mulf %109, %117 : vector<32x32xf32>
    %119 = vector.shape_cast %100 : vector<32x1xi1> to vector<32x1xi1>
    %120 = vector.broadcast %119 : vector<32x1xi1> to vector<32x32xi1>
    %121 = arith.select %120, %118, %9 : vector<32x32xi1>, vector<32x32xf32>
    %cst_53 = arith.constant dense<0.000000e+00> : vector<32x32xf32>
    %122 = tpu.matmul %121, %73, %cst_53 {dimension_numbers = #tpu.dot_dimension_numbers<[1], [0], [0], [1], [0, 0, 1, 1], [], []>} : vector<32x32xf32>, vector<32x32xf32>, vector<32x32xf32> -> vector<32x32xf32>
    %c0_54 = arith.constant 0 : index
    %c0_55 = arith.constant 0 : index
    %c32_56 = arith.constant 32 : index
    %123 = vector.load %arg5[%c0_54, %c0_55, %c32_56] : memref<1x32x128xf32, #tpu.memory_space<vmem>>, vector<1x32x32xf32>
    %124 = vector.shape_cast %123 : vector<1x32x32xf32> to vector<32x32xf32>
    %125 = vector.shape_cast %122 : vector<32x32xf32> to vector<1x32x32xf32>
    tpu.vector_store %arg5[%c0_54, %c0_55, %c32_56], %125 {strides = array<i32>} : memref<1x32x128xf32, #tpu.memory_space<vmem>>, vector<1x32x32xf32>,
    %c0_57 = arith.constant 0 : index
    %c0_58 = arith.constant 0 : index
    %c64 = arith.constant 64 : index
    %126 = vector.load %arg2[%c0_57, %c0_58, %c64] : memref<1x32x128xf32, #tpu.memory_space<vmem>>, vector<1x32x32xf32>
    %127 = vector.shape_cast %126 : vector<1x32x32xf32> to vector<32x32xf32>
    %c0_59 = arith.constant 0 : index
    %c0_60 = arith.constant 0 : index
    %c64_61 = arith.constant 64 : index
    %128 = vector.load %arg3[%c0_59, %c0_60, %c64_61] : memref<1x32x128xf32, #tpu.memory_space<vmem>>, vector<1x32x32xf32>
    %129 = vector.shape_cast %128 : vector<1x32x32xf32> to vector<32x32xf32>
    %c0_62 = arith.constant 0 : index
    %c0_63 = arith.constant 0 : index
    %c64_64 = arith.constant 64 : index
    %130 = vector.load %arg4[%c0_62, %c0_63, %c64_64] : memref<1x32x128xf32, #tpu.memory_space<vmem>>, vector<1x32x32xf32>
    %131 = vector.shape_cast %130 : vector<1x32x32xf32> to vector<32x32xf32>
    %cst_65 = arith.constant dense<0.000000e+00> : vector<32x32xf32>
    %132 = tpu.matmul %127, %129, %cst_65 {dimension_numbers = #tpu.dot_dimension_numbers<[1], [1], [0], [0], [0, 0, 1, 0], [], []>} : vector<32x32xf32>, vector<32x32xf32>, vector<32x32xf32> -> vector<32x32xf32>
    %cst_66 = arith.constant 0xFF800000 : f32
    %133 = vector.broadcast %cst_66 : f32 to vector<32x32xf32>
    %134 = arith.select %2, %132, %133 : vector<32x32xi1>, vector<32x32xf32>
    %cst_67 = arith.constant dense<0xFF800000> : vector<32xf32>
    %135 = vector.multi_reduction <maximumf>, %134, %cst_67 [1] : vector<32x32xf32> to vector<32xf32>
    %136 = vector.shape_cast %135 : vector<32xf32> to vector<32x1xf32>
    %cst_68 = arith.constant 0.000000e+00 : f32
    %137 = vector.broadcast %cst_68 : f32 to vector<32x32xf32>
    %138 = arith.select %2, %132, %137 : vector<32x32xi1>, vector<32x32xf32>
    %cst_69 = arith.constant dense<0.000000e+00> : vector<32xf32>
    %139 = vector.multi_reduction <add>, %138, %cst_69 [1] : vector<32x32xf32> to vector<32xf32>
    %140 = vector.shape_cast %139 : vector<32xf32> to vector<32x1xf32>
    %cst_70 = arith.constant 3.125000e-02 : f32
    %141 = vector.broadcast %cst_70 : f32 to vector<32x1xf32>
    %142 = arith.mulf %140, %141 : vector<32x1xf32>
    %143 = arith.subf %136, %142 : vector<32x1xf32>
    %cst_71 = arith.constant 0xFF800000 : f32
    %144 = vector.shape_cast %143 : vector<32x1xf32> to vector<32x1xf32>
    %145 = vector.broadcast %144 : vector<32x1xf32> to vector<32x32xf32>
    %146 = vector.broadcast %cst_71 : f32 to vector<32x32xf32>
    %147 = arith.select %6, %145, %146 : vector<32x32xi1>, vector<32x32xf32>
    %cst_72 = arith.constant dense<0xFF800000> : vector<32xf32>
    %148 = vector.multi_reduction <maximumf>, %147, %cst_72 [0] : vector<32x32xf32> to vector<32xf32>
    %149 = vector.shape_cast %148 : vector<32xf32> to vector<1x32xf32>
    %150 = vector.broadcast %149 : vector<1x32xf32> to vector<32x32xf32>
    %151 = vector.broadcast %143 : vector<32x1xf32> to vector<32x32xf32>
    %152 = arith.cmpf ogt, %150, %151 : vector<32x32xf32>
    %153 = arith.extui %152 : vector<32x32xi1> to vector<32x32xi32>
    %154 = arith.sitofp %153 : vector<32x32xi32> to vector<32x32xf32>
    %cst_73 = arith.constant dense<0.000000e+00> : vector<32xf32>
    %155 = vector.multi_reduction <add>, %154, %cst_73 [1] : vector<32x32xf32> to vector<32xf32>
    %156 = vector.shape_cast %155 : vector<32xf32> to vector<32x1xf32>
    %cst_74 = arith.constant 2.000000e+01 : f32
    %157 = vector.broadcast %cst_74 : f32 to vector<32x1xf32>
    %158 = arith.cmpf olt, %156, %157 : vector<32x1xf32>
    %cst_75 = arith.constant 0.176776692 : f32
    %159 = vector.broadcast %cst_75 : f32 to vector<32x32xf32>
    %160 = arith.mulf %132, %159 : vector<32x32xf32>
    %cst_76 = arith.constant 0xFF800000 : f32
    %161 = vector.broadcast %cst_76 : f32 to vector<32x32xf32>
    %162 = arith.select %5, %161, %160 : vector<32x32xi1>, vector<32x32xf32>
    %cst_77 = arith.constant dense<0xFF800000> : vector<32xf32>
    %163 = vector.multi_reduction <maximumf>, %162, %cst_77 [1] : vector<32x32xf32> to vector<32xf32>
    %164 = vector.shape_cast %163 : vector<32xf32> to vector<32x1xf32>
    %165 = vector.broadcast %164 : vector<32x1xf32> to vector<32x32xf32>
    %166 = arith.subf %162, %165 : vector<32x32xf32>
    %167 = math.exp %166 : vector<32x32xf32>
    %cst_78 = arith.constant dense<0.000000e+00> : vector<32xf32>
    %168 = vector.multi_reduction <add>, %167, %cst_78 [1] : vector<32x32xf32> to vector<32xf32>
    %169 = vector.shape_cast %168 : vector<32xf32> to vector<32x1xf32>
    %170 = tpu.reciprocal %169 {approx = true} : vector<32x1xf32> -> vector<32x1xf32>
    %171 = arith.mulf %169, %170 : vector<32x1xf32>
    %cst_79 = arith.constant 2.000000e+00 : f32
    %172 = vector.broadcast %cst_79 : f32 to vector<32x1xf32>
    %173 = arith.subf %172, %171 : vector<32x1xf32>
    %174 = arith.mulf %170, %173 : vector<32x1xf32>
    %175 = vector.broadcast %174 : vector<32x1xf32> to vector<32x32xf32>
    %176 = arith.mulf %167, %175 : vector<32x32xf32>
    %177 = vector.shape_cast %158 : vector<32x1xi1> to vector<32x1xi1>
    %178 = vector.broadcast %177 : vector<32x1xi1> to vector<32x32xi1>
    %179 = arith.select %178, %176, %9 : vector<32x32xi1>, vector<32x32xf32>
    %cst_80 = arith.constant dense<0.000000e+00> : vector<32x32xf32>
    %180 = tpu.matmul %179, %131, %cst_80 {dimension_numbers = #tpu.dot_dimension_numbers<[1], [0], [0], [1], [0, 0, 1, 1], [], []>} : vector<32x32xf32>, vector<32x32xf32>, vector<32x32xf32> -> vector<32x32xf32>
    %c0_81 = arith.constant 0 : index
    %c0_82 = arith.constant 0 : index
    %c64_83 = arith.constant 64 : index
    %181 = vector.load %arg5[%c0_81, %c0_82, %c64_83] : memref<1x32x128xf32, #tpu.memory_space<vmem>>, vector<1x32x32xf32>
    %182 = vector.shape_cast %181 : vector<1x32x32xf32> to vector<32x32xf32>
    %183 = vector.shape_cast %180 : vector<32x32xf32> to vector<1x32x32xf32>
    tpu.vector_store %arg5[%c0_81, %c0_82, %c64_83], %183 {strides = array<i32>} : memref<1x32x128xf32, #tpu.memory_space<vmem>>, vector<1x32x32xf32>,
    %c0_84 = arith.constant 0 : index
    %c0_85 = arith.constant 0 : index
    %c96 = arith.constant 96 : index
    %184 = vector.load %arg2[%c0_84, %c0_85, %c96] : memref<1x32x128xf32, #tpu.memory_space<vmem>>, vector<1x32x32xf32>
    %185 = vector.shape_cast %184 : vector<1x32x32xf32> to vector<32x32xf32>
    %c0_86 = arith.constant 0 : index
    %c0_87 = arith.constant 0 : index
    %c96_88 = arith.constant 96 : index
    %186 = vector.load %arg3[%c0_86, %c0_87, %c96_88] : memref<1x32x128xf32, #tpu.memory_space<vmem>>, vector<1x32x32xf32>
    %187 = vector.shape_cast %186 : vector<1x32x32xf32> to vector<32x32xf32>
    %c0_89 = arith.constant 0 : index
    %c0_90 = arith.constant 0 : index
    %c96_91 = arith.constant 96 : index
    %188 = vector.load %arg4[%c0_89, %c0_90, %c96_91] : memref<1x32x128xf32, #tpu.memory_space<vmem>>, vector<1x32x32xf32>
    %189 = vector.shape_cast %188 : vector<1x32x32xf32> to vector<32x32xf32>
    %cst_92 = arith.constant dense<0.000000e+00> : vector<32x32xf32>
    %190 = tpu.matmul %185, %187, %cst_92 {dimension_numbers = #tpu.dot_dimension_numbers<[1], [1], [0], [0], [0, 0, 1, 0], [], []>} : vector<32x32xf32>, vector<32x32xf32>, vector<32x32xf32> -> vector<32x32xf32>
    %cst_93 = arith.constant 0xFF800000 : f32
    %191 = vector.broadcast %cst_93 : f32 to vector<32x32xf32>
    %192 = arith.select %2, %190, %191 : vector<32x32xi1>, vector<32x32xf32>
    %cst_94 = arith.constant dense<0xFF800000> : vector<32xf32>
    %193 = vector.multi_reduction <maximumf>, %192, %cst_94 [1] : vector<32x32xf32> to vector<32xf32>
    %194 = vector.shape_cast %193 : vector<32xf32> to vector<32x1xf32>
    %cst_95 = arith.constant 0.000000e+00 : f32
    %195 = vector.broadcast %cst_95 : f32 to vector<32x32xf32>
    %196 = arith.select %2, %190, %195 : vector<32x32xi1>, vector<32x32xf32>
    %cst_96 = arith.constant dense<0.000000e+00> : vector<32xf32>
    %197 = vector.multi_reduction <add>, %196, %cst_96 [1] : vector<32x32xf32> to vector<32xf32>
    %198 = vector.shape_cast %197 : vector<32xf32> to vector<32x1xf32>
    %cst_97 = arith.constant 3.125000e-02 : f32
    %199 = vector.broadcast %cst_97 : f32 to vector<32x1xf32>
    %200 = arith.mulf %198, %199 : vector<32x1xf32>
    %201 = arith.subf %194, %200 : vector<32x1xf32>
    %cst_98 = arith.constant 0xFF800000 : f32
    %202 = vector.shape_cast %201 : vector<32x1xf32> to vector<32x1xf32>
    %203 = vector.broadcast %202 : vector<32x1xf32> to vector<32x32xf32>
    %204 = vector.broadcast %cst_98 : f32 to vector<32x32xf32>
    %205 = arith.select %6, %203, %204 : vector<32x32xi1>, vector<32x32xf32>
    %cst_99 = arith.constant dense<0xFF800000> : vector<32xf32>
    %206 = vector.multi_reduction <maximumf>, %205, %cst_99 [0] : vector<32x32xf32> to vector<32xf32>
    %207 = vector.shape_cast %206 : vector<32xf32> to vector<1x32xf32>
    %208 = vector.broadcast %207 : vector<1x32xf32> to vector<32x32xf32>
    %209 = vector.broadcast %201 : vector<32x1xf32> to vector<32x32xf32>
    %210 = arith.cmpf ogt, %208, %209 : vector<32x32xf32>
    %211 = arith.extui %210 : vector<32x32xi1> to vector<32x32xi32>
    %212 = arith.sitofp %211 : vector<32x32xi32> to vector<32x32xf32>
    %cst_100 = arith.constant dense<0.000000e+00> : vector<32xf32>
    %213 = vector.multi_reduction <add>, %212, %cst_100 [1] : vector<32x32xf32> to vector<32xf32>
    %214 = vector.shape_cast %213 : vector<32xf32> to vector<32x1xf32>
    %cst_101 = arith.constant 2.000000e+01 : f32
    %215 = vector.broadcast %cst_101 : f32 to vector<32x1xf32>
    %216 = arith.cmpf olt, %214, %215 : vector<32x1xf32>
    %cst_102 = arith.constant 0.176776692 : f32
    %217 = vector.broadcast %cst_102 : f32 to vector<32x32xf32>
    %218 = arith.mulf %190, %217 : vector<32x32xf32>
    %cst_103 = arith.constant 0xFF800000 : f32
    %219 = vector.broadcast %cst_103 : f32 to vector<32x32xf32>
    %220 = arith.select %5, %219, %218 : vector<32x32xi1>, vector<32x32xf32>
    %cst_104 = arith.constant dense<0xFF800000> : vector<32xf32>
    %221 = vector.multi_reduction <maximumf>, %220, %cst_104 [1] : vector<32x32xf32> to vector<32xf32>
    %222 = vector.shape_cast %221 : vector<32xf32> to vector<32x1xf32>
    %223 = vector.broadcast %222 : vector<32x1xf32> to vector<32x32xf32>
    %224 = arith.subf %220, %223 : vector<32x32xf32>
    %225 = math.exp %224 : vector<32x32xf32>
    %cst_105 = arith.constant dense<0.000000e+00> : vector<32xf32>
    %226 = vector.multi_reduction <add>, %225, %cst_105 [1] : vector<32x32xf32> to vector<32xf32>
    %227 = vector.shape_cast %226 : vector<32xf32> to vector<32x1xf32>
    %228 = tpu.reciprocal %227 {approx = true} : vector<32x1xf32> -> vector<32x1xf32>
    %229 = arith.mulf %227, %228 : vector<32x1xf32>
    %cst_106 = arith.constant 2.000000e+00 : f32
    %230 = vector.broadcast %cst_106 : f32 to vector<32x1xf32>
    %231 = arith.subf %230, %229 : vector<32x1xf32>
    %232 = arith.mulf %228, %231 : vector<32x1xf32>
    %233 = vector.broadcast %232 : vector<32x1xf32> to vector<32x32xf32>
    %234 = arith.mulf %225, %233 : vector<32x32xf32>
    %235 = vector.shape_cast %216 : vector<32x1xi1> to vector<32x1xi1>
    %236 = vector.broadcast %235 : vector<32x1xi1> to vector<32x32xi1>
    %237 = arith.select %236, %234, %9 : vector<32x32xi1>, vector<32x32xf32>
    %cst_107 = arith.constant dense<0.000000e+00> : vector<32x32xf32>
    %238 = tpu.matmul %237, %189, %cst_107 {dimension_numbers = #tpu.dot_dimension_numbers<[1], [0], [0], [1], [0, 0, 1, 1], [], []>} : vector<32x32xf32>, vector<32x32xf32>, vector<32x32xf32> -> vector<32x32xf32>
    %c0_108 = arith.constant 0 : index
    %c0_109 = arith.constant 0 : index
    %c96_110 = arith.constant 96 : index
    %239 = vector.load %arg5[%c0_108, %c0_109, %c96_110] : memref<1x32x128xf32, #tpu.memory_space<vmem>>, vector<1x32x32xf32>
    %240 = vector.shape_cast %239 : vector<1x32x32xf32> to vector<32x32xf32>
    %241 = vector.shape_cast %238 : vector<32x32xf32> to vector<1x32x32xf32>
    tpu.vector_store %arg5[%c0_108, %c0_109, %c96_110], %241 {strides = array<i32>} : memref<1x32x128xf32, #tpu.memory_space<vmem>>, vector<1x32x32xf32>,
    return
  }
  func.func @transform_0(%arg0: i32) -> (i32, i32) {
    %c0_i32 = arith.constant 0 : i32
    %c0_i32_0 = arith.constant 0 : i32
    %c0_i32_1 = arith.constant 0 : i32
    return %c0_i32, %c0_i32_0 : i32, i32
  }
  func.func @transform_1(%arg0: i32) -> (i32, i32, i32) {
    %c0_i32 = arith.constant 0 : i32
    %c0_i32_0 = arith.constant 0 : i32
    %c0_i32_1 = arith.constant 0 : i32
    return %arg0, %c0_i32, %c0_i32_0 : i32, i32, i32
  }
  func.func @transform_2(%arg0: i32) -> (i32, i32, i32) {
    %c0_i32 = arith.constant 0 : i32
    %c0_i32_0 = arith.constant 0 : i32
    %c0_i32_1 = arith.constant 0 : i32
    return %arg0, %c0_i32, %c0_i32_0 : i32, i32, i32
  }
  func.func @transform_3(%arg0: i32) -> (i32, i32, i32) {
    %c0_i32 = arith.constant 0 : i32
    %c0_i32_0 = arith.constant 0 : i32
    %c0_i32_1 = arith.constant 0 : i32
    return %arg0, %c0_i32, %c0_i32_0 : i32, i32, i32
  }
  func.func @transform_4(%arg0: i32) -> (i32, i32, i32) {
    %c0_i32 = arith.constant 0 : i32
    %c0_i32_0 = arith.constant 0 : i32
    %c0_i32_1 = arith.constant 0 : i32
    return %arg0, %c0_i32, %c0_i32_0 : i32, i32, i32
  }
}

</mosaic_0001>

<bundles_post_ra>
// kernel: tpu_custom_call.1
= control target key start
LH: loop header
LB: loop body
LE: loop exit
PB: predicated region body
PF: predicated region fallthrough
CT: control target
= control target key end

     0   :  { %s3964_s0 = inlined_call_operand.hbm [shape: s8[32,32], index: 0, kind: input, shape index: {}]   ;;  %s3965_s1 = inlined_call_operand.hbm [shape: f32[2,32,128], index: 1, kind: input, shape index: {}]   ;;  %s3966_s2 = inlined_call_operand.hbm [shape: f32[2,32,128], index: 2, kind: input, shape index: {}]   ;;  %s3967_s3 = inlined_call_operand.hbm [shape: f32[2,32,128], index: 3, kind: input, shape index: {}]   ;;  %s3968_s4 = inlined_call_operand.hbm [shape: f32[2,32,128], index: 4, kind: output, shape index: {}]  }
   0x1   :  { %3989 = sst [smem:[#allocation19_spill]] %s3965_s1 }
   0x2   :  { %3990 = sst [smem:[#allocation20_spill]] %s3966_s2 }
   0x3   :  { %9 = vsyncpa [#allocation3], 0 }
   0x4   :  { %10 = vsyncpa [#allocation6], 0 }
   0x5   :  { %12 = vsyncpa [#allocation6 + $0x1], 0 }
   0x6   :  { %13 = vsyncpa [#allocation9], 0 }
   0x7   :  { %15 = vsyncpa [#allocation9 + $0x1], 0 }
   0x8   :  { %16 = vsyncpa [#allocation4], 0 }
   0x9   :  { %18 = vsyncpa [#allocation4 + $0x1], 0  ;;  %s2963_s15 = smov 0   ;;  %s2965_s16 = smov 0  }
   0xa   :  { %s2967_s17 = smov 0   ;;  %s2969_s18 = smov 0  }
   0xb LB: > { %3991 = sst [smem:[#allocation15_spill]] %s2921_s18  ;;  %s2984_s19 = sadd.s32 1, %s2921_s18   ;;  %s2921_s18 = sphi %s2969_s18, %s4042_s18   ;;  %s2917_s17 = sphi %s2967_s17, %s4046_s17   ;;  %s2913_s16 = sphi %s2965_s16, %s4045_s16   ;;  %s2909_s15 = sphi %s2963_s15, %s4044_s15  }
   0xc   : > { %3992 = sst [smem:[#allocation16_spill]] %s2984_s19  ;;  %s52_s20 = sadd.s32 1, %s2917_s17 }
   0xd   : > { %s49_s21 = ssub.s32 %s2921_s18, %s2984_s19  ;;  %p3969_p0 = scmp.ne.s32.totalorder %s2917_s17, %s2913_s16 }
   0xe   : > { %p50_p1 = scmp.eq.s32.totalorder %s49_s21, 0  ;;  %p60_p2 = scmp.eq.s32.totalorder %s2921_s18, 0 }
   0xf   : > { %p2559_p4 = scmp.lt.s32.totalorder %s2921_s18, 2  ;;  %s178_s23 = sand.u32 1, %s2921_s18  }
  0x10   : > { %s2995_s22 = scalar_select %p50_p1, %s2917_s17, %s52_s20  }
  0x11   : > { %p61_p5 = por %p60_p2, %p3969_p0  ;;  %s3970_s24 = sand.u32 1, %s2917_s17  }
  0x12   : > { %3993 = sst [smem:[#allocation17_spill]] %s2995_s22  ;;  %s3004_s25 = sshll.u32 %s3970_s24, 5 }
  0x13   : > { %s3007_s26 = sshll.u32 %s2921_s18, 9  ;;  %s3994_s1 = sld [smem:[#allocation19_spill]] }
  0x14   : > { %s182_s30 = scalar_lea.vmem [#allocation5], %s3004_s25  ;;  %p3016_p6 = pnand %p2559_p4, %p61_p5 }
  0x15   : > { %s189_s5 = sshll.u32 %s182_s30, 4  ;;  %s3022_s7 = scalar_lea.sflag [#allocation6], %s178_s23  ;;  %s3020_s5 = int_to_ptr.vmem [resolvable:$true] %s189_s5 }
  0x16   : > { %s3995_s6 = scalar_select %p3016_p6, 1, 0 }
  0x17   : > { %p3028_p8 = pneg %p3016_p6 }
  0x19   : > { %s3013_s29 = scalar_lea.hbm %s3994_s1, %s3007_s26  ;;  %s2734_s12 = scalar_lea.hbm %s3994_s1, 1024 }
  0x1a   : > { %s2729_s8 = scalar_lea.hbm %s3013_s29, 512  ;;  %p2735_p11 = scmp.lt.u32.totalorder %s3013_s29, %s3994_s1 }
  0x1b   : > { %p2730_p7 = scmp.ne.s32.totalorder %s3013_s29, %s2729_s8  ;;  %p2736_p12 = scmp.lt.u32.totalorder %s2734_s12, %s2729_s8 }
  0x1c   : > { %s3996_s9 = scalar_select %p3028_p8, 1, 0 }
  0x1d   : > { %p2732_p9 = pnand %p3028_p8, %p2730_p7  ;;  %p2737_p13 = por %p2736_p12, %p2735_p11 }
  0x1e   : > { %p2738_p1 = scmp.lt.u32.totalorder %s2729_s8, %s3013_s29 }
  0x1f   : > { %p2733_p10 = pneg %p2732_p9 }
  0x20   : > { %p2739_p2 = por %p2738_p1, %p2737_p13 }
  0x22   : > { %p2740_p4 = pnand %p2739_p2, %p2733_p10 }
  0x24   : > { %2743 = shalt.err (!%p2740_p4)
}
  0x25   : > { %s2744_s20 = scalar_lea.vmem %s3020_s5, 512  ;;  %s2923_s21 = smov [#allocation5]  }
  0x26   : > { %p2745_p5 = scmp.ne.s32.totalorder %s3020_s5, %s2744_s20  ;;  %s2749_s23 = sshll.u32 %s2923_s21, 4  ;;  %s2750_s23 = int_to_ptr.vmem [resolvable:$false] %s2749_s23 }
  0x27   : > { %s2751_s27 = scalar_lea.vmem %s2750_s23, 1024  ;;  %p2752_p3 = scmp.lt.s32.totalorder %s3020_s5, %s2750_s23 }
  0x28   : > { %p2747_p7 = pnand %p2745_p5, %p3028_p8  ;;  %p2753_p0 = scmp.lt.s32.totalorder %s2751_s27, %s2744_s20 }
  0x2a   : > { %p2748_p9 = pneg %p2747_p7  ;;  %p2754_p11 = por %p2753_p0, %p2752_p3 }
  0x2c   : > { %p2755_p12 = pnand %p2754_p11, %p2748_p9 }
  0x2e   : > { %2758 = shalt.err (!%p2755_p12)
}
  0x2f   : > { %s3971_s28 = smov 128   ;;  %s3973_s30 = smov 8  }
  0x30   : > { %2547 = dma.hbm_to_vmem [thread:$0]  (!%p3016_p6), %s3013_s29, 512, %s3020_s5, %s3022_s7, %s3971_s28, %s3971_s28, %s3973_s30  }
  0x31   : > { %s3056_s8 = sadd.s32 4294967295, %s2921_s18   ;;  %s2180_s10 = sadd.s32 4294967294, %s2921_s18  }
  0x32   : > { %p65_p0 = scmp.ne.s32.totalorder %s2913_s16, %s2909_s15  ;;  %p3976_p3 = scmp.eq.s32.totalorder %s3056_s8, 0 }
  0x33   : > { %p141_p10 = scmp.eq.s32.totalorder %s3056_s8, 1  ;;  %p147_p13 = scmp.eq.s32.totalorder %s2180_s10, 1 }
  0x34   : > { %p3065_p1 = por %p3976_p3, %p65_p0  ;;  %p2181_p2 = scmp.ge.s32.totalorder %s2921_s18, 1 }
  0x35   : > { %p3998_p4 = scmp.ne.s32.totalorder %s2917_s17, %s2913_s16  ;;  %p3077_p7 = por %p147_p13, %p65_p0 }
  0x36   : > { %s3997_s11 = scalar_select %p3065_p1, 1, 0 }
  0x37   : > { %p3073_p5 = por %p141_p10, %p3998_p4  ;;  %p154_p9 = scmp.lt.s32.totalorder %s2921_s18, 3 }
  0x38   : > { %s4000_s5 = scalar_select %p3077_p7, 1, 0 }
  0x39   : > { %s3999_s29 = scalar_select %p3073_p5, 1, 0 }
  0x3a   : > { %4001 = sst [smem:[#allocation18_spill]] %s4000_s5  ;;  %p3082_p11 = pnand %p2181_p2, %p154_p9 }
  0x3b   : > { %s2926_s13 = smov [#allocation2]   ;;  %s4003_s2 = sld [smem:[#allocation20_spill]] }
  0x3c   : > { %s4002_s12 = scalar_select %p3082_p11, 1, 0 }
  0x3d   : > { %s167_s14 = sshll.u32 %s2926_s13, 4  ;;  %p2540_p12 = pneg %p3082_p11  ;;  %s3086_s14 = int_to_ptr.vmem [resolvable:$true] %s167_s14 }
  0x3e   : > { %s203_s27 = scalar_lea.vmem [#allocation7], %s3004_s25 }
  0x3f   : > { %s210_s10 = sshll.u32 %s203_s27, 4  ;;  %p3101_p0 = pnand %p2540_p12, %p3976_p3  ;;  %s3097_s10 = int_to_ptr.vmem [resolvable:$true] %s210_s10 }
  0x41   : > { %s3092_s23 = scalar_lea.hbm %s4003_s2, %s3007_s26  ;;  %s2764_s28 = scalar_lea.hbm %s4003_s2, 1024 }
  0x42   : > { %s4004_s13 = scalar_select %p3101_p0, 1, 0 }
  0x43   : > { %s2759_s24 = scalar_lea.hbm %s3092_s23, 512  ;;  %p2765_p4 = scmp.lt.u32.totalorder %s3092_s23, %s4003_s2 }
  0x44   : > { %p2760_p10 = scmp.ne.s32.totalorder %s3092_s23, %s2759_s24  ;;  %p2766_p9 = scmp.lt.u32.totalorder %s2764_s28, %s2759_s24 }
  0x45   : > { %p2768_p5 = scmp.lt.u32.totalorder %s2759_s24, %s3092_s23 }
  0x46   : > { %p2762_p13 = pnand %p2760_p10, %p3028_p8  ;;  %p2767_p7 = por %p2766_p9, %p2765_p4 }
  0x48   : > { %p2763_p2 = pneg %p2762_p13  ;;  %p2769_p12 = por %p2768_p5, %p2767_p7 }
  0x4a   : > { %p2770_p3 = pnand %p2769_p12, %p2763_p2 }
  0x4c   : > { %2773 = shalt.err (!%p2770_p3)
}
  0x4d   : > { %s2774_s27 = scalar_lea.vmem %s3097_s10, 512  ;;  %s2927_s20 = smov [#allocation7]  }
  0x4e   : > { %p2775_p10 = scmp.ne.s32.totalorder %s3097_s10, %s2774_s27  ;;  %s2779_s21 = sshll.u32 %s2927_s20, 4  ;;  %s2780_s21 = int_to_ptr.vmem [resolvable:$false] %s2779_s21 }
  0x4f   : > { %s2781_s1 = scalar_lea.vmem %s2780_s21, 1024  ;;  %p2782_p11 = scmp.lt.s32.totalorder %s3097_s10, %s2780_s21 }
  0x50   : > { %p2777_p13 = pnand %p2775_p10, %p3028_p8  ;;  %p2783_p0 = scmp.lt.s32.totalorder %s2781_s1, %s2774_s27 }
  0x52   : > { %p2778_p1 = pneg %p2777_p13  ;;  %p2784_p4 = por %p2783_p0, %p2782_p11 }
  0x54   : > { %p2785_p9 = pnand %p2784_p4, %p2778_p1 }
  0x56   : > { %2788 = shalt.err (!%p2785_p9)
}
  0x57   : > { %s4005_s24 = smov 8   ;;  %s4006_s28 = smov 128  }
  0x58   : > { %2550 = dma.hbm_to_vmem [thread:$0]  (!%p3016_p6), %s3092_s23, 512, %s3097_s10, %s3022_s7, %s4006_s28, %s4006_s28, %s4005_s24  }
  0x59   : > { %s3134_s2 = scalar_lea.hbm %s3967_s3, %s3007_s26  ;;  %s2789_s1 = scalar_lea.hbm %s3964_s0, 128 }
  0x5a   : > { %p2790_p3 = scmp.ne.s32.totalorder %s3964_s0, %s2789_s1  ;;  %p4007_p1 = scmp.ne.s32.totalorder %s4004_s13, 0 }
  0x5b   : > { %p2796_p0 = scmp.lt.u32.totalorder %s2789_s1, %s3964_s0 }
  0x5c   : > { %p2791_p5 = pneg %p4007_p1 }
  0x5e   : > { %p2792_p7 = pnand %p2791_p5, %p2790_p3 }
  0x60   : > { %p2793_p11 = pneg %p2792_p7 }
  0x62   : > { %p2798_p2 = pnand %p2796_p0, %p2793_p11 }
  0x64   : > { %2801 = shalt.err (!%p2798_p2)
}
  0x65   : > { %s2802_s26 = scalar_lea.vmem %s3086_s14, 128  ;;  %p2810_p4 = scmp.lt.s32.totalorder %s3086_s14, %s3086_s14 }
  0x66   : > { %p2803_p12 = scmp.ne.s32.totalorder %s3086_s14, %s2802_s26  ;;  %p2811_p9 = scmp.lt.s32.totalorder %s2802_s26, %s2802_s26 }
  0x68   : > { %p2805_p10 = pnand %p2803_p12, %p2791_p5  ;;  %p2812_p6 = por %p2811_p9, %p2810_p4 }
  0x6a   : > { %p2806_p13 = pneg %p2805_p10 }
  0x6c   : > { %p2813_p8 = pnand %p2812_p6, %p2806_p13 }
  0x6e   : > { %2816 = shalt.err (!%p2813_p8)
}
  0x6f   : > { %2543 = dma.hbm_to_vmem [thread:$0]  (!%p4007_p1), %s3964_s0, 128, %s3086_s14, [#allocation3]  }
  0x70   : > { %s224_s22 = scalar_lea.vmem [#allocation8], %s3004_s25  ;;  %s4008_s5 = sand.u32 1, %s2917_s17  }
  0x71   : > { %s231_s7 = sshll.u32 %s224_s22, 4  ;;  %s3162_s23 = scalar_lea.sflag [#allocation9], %s4008_s5  ;;  %s3158_s7 = int_to_ptr.vmem [resolvable:$true] %s231_s7 }
  0x72   : > { %s2817_s10 = scalar_lea.hbm %s3134_s2, 512  ;;  %p4009_p8 = scmp.ne.s32.totalorder %s3996_s9, 0 }
  0x73   : > { %p2818_p6 = scmp.ne.s32.totalorder %s3134_s2, %s2817_s10  ;;  %s2822_s20 = scalar_lea.hbm %s3967_s3, 1024 }
  0x74   : > { %p2823_p1 = scmp.lt.u32.totalorder %s3134_s2, %s3967_s3  ;;  %p2824_p7 = scmp.lt.u32.totalorder %s2822_s20, %s2817_s10 }
  0x75   : > { %p2820_p3 = pnand %p2818_p6, %p4009_p8  ;;  %p2826_p0 = scmp.lt.u32.totalorder %s2817_s10, %s3134_s2 }
  0x76   : > { %p2825_p11 = por %p2824_p7, %p2823_p1 }
  0x77   : > { %p2821_p5 = pneg %p2820_p3 }
  0x78   : > { %p2827_p2 = por %p2826_p0, %p2825_p11 }
  0x7a   : > { %p2828_p12 = pnand %p2827_p2, %p2821_p5 }
  0x7c   : > { %2831 = shalt.err (!%p2828_p12)
}
  0x7d   : > { %s2832_s25 = scalar_lea.vmem %s3158_s7, 512  ;;  %s2928_s14 = smov [#allocation8]  }
  0x7e   : > { %p2833_p10 = scmp.ne.s32.totalorder %s3158_s7, %s2832_s25  ;;  %s2837_s1 = sshll.u32 %s2928_s14, 4  ;;  %s2838_s1 = int_to_ptr.vmem [resolvable:$false] %s2837_s1 }
  0x7f   : > { %s2839_s26 = scalar_lea.vmem %s2838_s1, 1024  ;;  %p2840_p9 = scmp.lt.s32.totalorder %s3158_s7, %s2838_s1 }
  0x80   : > { %p2835_p13 = pnand %p2833_p10, %p4009_p8  ;;  %p2841_p6 = scmp.lt.s32.totalorder %s2839_s26, %s2832_s25 }
  0x82   : > { %p2836_p4 = pneg %p2835_p13  ;;  %p2842_p3 = por %p2841_p6, %p2840_p9 }
  0x84   : > { %p2843_p1 = pnand %p2842_p3, %p2836_p4 }
  0x86   : > { %2846 = shalt.err (!%p2843_p1)
}
  0x87   : > { %p4010_p5 = scmp.ne.s32.totalorder %s3995_s6, 0  ;;  %p4011_p8 = scmp.ne.s32.totalorder %s4002_s12, 0 }
  0x88   : > { %p4012_p7 = scmp.eq.s32.totalorder (!%p4011_p8), %s3056_s8, 0 }
  0x89   : > { %2553 = dma.hbm_to_vmem [thread:$0]  (!%p4010_p5), %s3134_s2, 512, %s3158_s7, %s3162_s23, %s4006_s28, %s4006_s28, %s4005_s24  }
  0x8a   : > { %243 = sbr.rel (%p4011_p8) target bundleno = 2993 (0xbb1), region = 36 }
  0x91   : > { %2892 = dma.done.wait (%p4012_p7), [#allocation3], 128   ;;  %p4013_p11 = pmov %p4012_p7 }
  0x92   : > { %s249_s6 = sand.u32 1, %s3056_s8   ;;  %s3197_s9 = sand.u32 1, %s2913_s16  }
  0x93   : > { %2894 = vsyncadd (%p4013_p11), [#allocation3], 4294967168  ;;  %s3200_s18 = sshll.u32 %s3197_s9, 5  ;;  %s250_s2 = scalar_lea.sflag [#allocation6], %s249_s6 }
  0x94   : > { %s3203_s24 = scalar_lea.vmem [#allocation5], %s3200_s18  ;;  %p4014_p0 = scmp.ne.s32.totalorder %s3997_s11, 0 }
  0x96   : > { %2896 = dma.done.wait (%p4014_p0), %s250_s2, 1024  }
  0x97   : > { %2898 = vsyncadd (%p4014_p0), %s250_s2, 4294966272  ;;  %s3210_s12 = scalar_lea.vmem [#allocation7], %s3200_s18  ;;  %s268_s28 = scalar_lea.sflag [#allocation9], %s3197_s9 }
  0x98   : > { %s3214_s19 = scalar_lea.vmem [#allocation8], %s3200_s18 }
  0x99   : > { %2900 = dma.done.wait (%p4014_p0), %s268_s28, 512  }
  0x9a   : > { %2902 = vsyncadd (%p4014_p0), %s268_s28, 4294966784  ;;  %vm341_vm0 = vcmask 261120   ;;  %v3227_v1 = vld [vmem:[%s3210_s12] sm:$0xff]  ;;  %v3230_v2 = vld [vmem:[%s3210_s12 + $0x8] sm:$0xff]  ;;  %v2929_v12 = vmov 0   ;;  %v310_v23 = vlaneseq  ;;  %s2931_s11 = smov 96  }
  0x9b   : > { %vm3222_vm1 = vmpackc.low %vm341_vm0, %vm341_vm0  ;;  %v3233_v3 = vld [vmem:[%s3210_s12 + $0x10] sm:$0xff]  ;;  %v2448_v4 = vpack.c.bf16 %v3230_v2, %v3227_v1  ;;  %v3238_v5 = vld [vmem:[%s3210_s12 + $0x18] sm:$0xff]  ;;  %s3494_s22 = scalar_lea.vmem [#allocation10], %s3200_s18  ;;  %s2933_s7 = smov 64  }
  0x9c   : > { %v3241_v6 = vld [vmem:[%s3203_s24] sm:$0xff]  ;;  %v2454_v7 = vpack.c.bf16 %v3238_v5, %v3233_v3  ;;  %v3256_v8 = vld [vmem:[%s3203_s24 + $0x8] sm:$0xff]  ;;  %v3259_v9 = vld [vmem:[%s3203_s24 + $0x10] sm:$0xff]  ;;  %v3270_v28 = vshrl.u32 %v310_v23, 7  ;;  %v3275_v33 = vand.u32 127, %v310_v23  ;;  %s2934_s5 = smov 32  }
  0x9d   : > { %2344 = vmatprep.mubr.msk.f32.mxu0 %vm341_vm0, %v3241_v6  ;;  %2450 = vmatprep.subr.msk.bf16.mxu0 %vm3222_vm1, %v2448_v4  ;;  %v3266_v10 = vld [vmem:[%s3203_s24 + $0x18] sm:$0xff]  ;;  %s2271_s23 = sshll.u32 %s3056_s8, 9  ;;  %s2052_s10 = sshll.u32 %s3494_s22, 4  ;;  %s3918_s10 = int_to_ptr.vmem [resolvable:$true] %s2052_s10 }
  0x9e   : > { %2453 = vmatpush3.bf16.xpose.msk.msra.mxu0 %vm3222_vm1, %v2448_v4  ;;  %v308_v11 = vld [vmem:[#allocation2] sm:$0xff]  ;;  %v3273_v32 = vadd.s32 8, %v3270_v28  ;;  %vm3303_vm10 = vcmp.gt.s32.totalorder %v3275_v33, %v3270_v28  ;;  %vm321_vm15 = vcmp.eq.s32.totalorder %v3275_v33, %v3270_v28  ;;  %s3916_s20 = scalar_lea.hbm %s3968_s4, %s2271_s23  ;;  %s2039_s27 = scalar_lea.sflag [#allocation4], %s3197_s9 }
  0x9f   : > { %2456 = vmatprep.subr.msk.bf16.mxu0 %vm3222_vm1, %v2454_v7  ;;  %vm309_vm2 = vnez %v308_v11  ;;  %s2847_s8 = scalar_lea.vmem %s3918_s10, 512  ;;  %p4037_p12 = scmp.ne.s32.totalorder %s3999_s29, 0 }
  0xa0   : > { %v451_v13 = vsel %vm309_vm2, 16843009, %v2929_v12  ;;  %vm3289_vm9 = vcmp.gt.s32.totalorder %v3275_v33, %v3273_v32  ;;  %vm322_vm2 = vcmp.eq.s32.totalorder %v3275_v33, %v3273_v32  ;;  %p2848_p2 = scmp.ne.s32.totalorder %s3918_s10, %s2847_s8  ;;  %s2935_s21 = smov [#allocation10]  }
  0xa1   : > { %v453_v14 = vunpack.c.1.s8 %v451_v13  ;;  %v452_v15 = vunpack.c.0.s8 %v451_v13  ;;  %v455_v19 = vunpack.c.3.s8 %v451_v13  ;;  %v454_v21 = vunpack.c.2.s8 %v451_v13  ;;  %s2851_s25 = sshll.u32 %s2935_s21, 4  ;;  %s2852_s25 = int_to_ptr.vmem [resolvable:$false] %s2851_s25 }
  0xa2   : > { %p2849_p10 = pnand %p2848_p2, %p4037_p12  ;;  %s2853_s14 = scalar_lea.vmem %s2852_s25, 1024 }
  0xa3   : > { %v458_v16 = vpack.c.b16 %v453_v14, %v453_v14  ;;  %v456_v17 = vpack.c.b16 %v452_v15, %v452_v15  ;;  %v462_v22 = vpack.c.b16 %v455_v19, %v455_v19  ;;  %v460_v24 = vpack.c.b16 %v454_v21, %v454_v21  ;;  %p2854_p4 = scmp.lt.s32.totalorder %s3918_s10, %s2852_s25  ;;  %p2855_p9 = scmp.lt.s32.totalorder %s2853_s14, %s2847_s8 }
  0xa4   : > { %p2850_p13 = pneg %p2849_p10 }
  0xa5   : > { %v459_v18 = vpack.c.b8 %v458_v16, %v458_v16  ;;  %v457_v20 = vpack.c.b8 %v456_v17, %v456_v17  ;;  %v463_v27 = vpack.c.b8 %v462_v22, %v462_v22  ;;  %v461_v29 = vpack.c.b8 %v460_v24, %v460_v24  ;;  %p2856_p6 = por %p2855_p9, %p2854_p4 }
  0xa6   : > { %2459 = vmatpush3.bf16.xpose.msk.msra.mxu0 %vm3222_vm1, %v2454_v7  ;;  %v3329_v7 = vadd.s32 24, %v3270_v28 }
  0xa7   : > { %vm465_vm3 = vnez %v459_v18  ;;  %vm464_vm4 = vnez %v457_v20  ;;  %vm467_vm5 = vnez %v463_v27  ;;  %vm466_vm6 = vnez %v461_v29  ;;  %p2857_p3 = pnand %p2856_p6, %p2850_p13 }
  0xa8   : > { %v469_v25 = vsel %vm465_vm3, 16843009, %v2929_v12  ;;  %v468_v26 = vsel %vm464_vm4, 16843009, %v2929_v12  ;;  %v471_v36 = vsel %vm467_vm5, 16843009, %v2929_v12  ;;  %vm3341_vm13 = vcmp.gt.s32.totalorder %v3275_v33, %v3329_v7 }
  0xa9   : > { %v473_v30 = vunpack.c.0.s8 %v469_v25  ;;  %v472_v31 = vunpack.c.0.s8 %v468_v26  ;;  %v470_v38 = vsel %vm466_vm6, 16843009, %v2929_v12  ;;  %v475_v45 = vunpack.c.0.s8 %v471_v36 }
  0xaa   : > { %v474_v48 = vunpack.c.0.s8 %v470_v38  ;;  %v3333_v12 = vadd.s32 16, %v3270_v28  ;;  %vm3988_vm3 = vcmp.eq.s32.totalorder %v3275_v33, %v3329_v7 }
  0xab   : > { %vm3277_vm7 = vcmp.ne.s32.totalorder %v473_v30, 0  ;;  %vm3281_vm8 = vcmp.ne.s32.totalorder %v472_v31, 0  ;;  %vm3308_vm11 = vcmp.ne.s32.totalorder %v475_v45, 0 }
  0xac   : > { %vm3315_vm12 = vcmp.ne.s32.totalorder %v474_v48, 0  ;;  %vm3347_vm14 = vcmp.gt.s32.totalorder %v3275_v33, %v3333_v12  ;;  %vm3987_vm4 = vcmp.eq.s32.totalorder %v3275_v33, %v3333_v12 }
  0xad   : > { %2345 = vmatmul.mubr.msk.f32.vlgmr.msra.gmra.mrb[0].mxu0 %vm341_vm0, %v3256_v8 }
  0xae   : > { %2347 = vmatprep.mubr.msk.f32.mxu0 %vm341_vm0, %v3259_v9 }
  0xb1   : > { %2348 = vmatmul.mubr.msk.f32.gmra.mrb[2].mxu0 %vm341_vm0, %v3266_v10 }
 0x180   : > { %v2346_v37 = vpop.f32.mrb[0].mxu0 }
 0x181   : > { %v432_v39 = vpop.f32.mrb[1].mxu0  ;;  %v497_v40 = vsel %vm3277_vm7, %v2346_v37, 0.0  ;;  %v566_v42 = vmul.f32 0.17677669, %v2346_v37  ;;  %v481_v47 = vsel %vm3277_vm7, %v2346_v37, -inf }
 0x182   : > { %v503_v43 = vsel %vm341_vm0, %v497_v40, 0.0  ;;  %v480_v44 = vsel %vm3281_vm8, %v432_v39, -inf  ;;  %v565_v51 = vmul.f32 0.17677669, %v432_v39  ;;  %v487_v54 = vsel %vm341_vm0, %v481_v47, -inf }
 0x183   : > { %504 = vadd.xlane.f32.xlu1 %v503_v43  ;;  %v484_v46 = vsel %vm341_vm0, %v480_v44, -inf  ;;  %v570_v49 = vsel %vm3289_vm9, -inf, %v566_v42  ;;  %v496_v57 = vsel %vm3281_vm8, %v432_v39, 0.0 }
 0x184   : > { %485 = vmax.xlane.f32.xlu0 %v484_v46  ;;  %v2349_v50 = vpop.f32.mrb[2].mxu0  ;;  %v576_v56 = vsel %vm341_vm0, %v570_v49, -inf  ;;  %v569_v59 = vsel %vm3303_vm10, -inf, %v565_v51  ;;  %v500_v61 = vsel %vm341_vm0, %v496_v57, 0.0 }
 0x185   : > { %v442_v52 = vpop.f32.mrb[3].mxu0  ;;  %v499_v60 = vsel %vm3308_vm11, %v2349_v50, 0.0  ;;  %v573_v63 = vsel %vm341_vm0, %v569_v59, -inf  ;;  %v483_v13 = vsel %vm3308_vm11, %v2349_v50, -inf  ;;  %v568_v14 = vmul.f32 0.17677669, %v2349_v50 }
 0x186   : > { %v498_v62 = vsel %vm3315_vm12, %v442_v52, 0.0  ;;  %v509_v4 = vsel %vm341_vm0, %v499_v60, 0.0  ;;  %v482_v15 = vsel %vm3315_vm12, %v442_v52, -inf  ;;  %v567_v17 = vmul.f32 0.17677669, %v442_v52 }
 0x187   : > { %488 = vmax.xlane.f32.xlu1 %v487_v54  ;;  %v506_v11 = vsel %vm341_vm0, %v498_v62, 0.0  ;;  %v493_v19 = vsel %vm341_vm0, %v483_v13, -inf  ;;  %v490_v20 = vsel %vm341_vm0, %v482_v15, -inf  ;;  %v572_v21 = vsel %vm3341_vm13, -inf, %v568_v14 }
 0x188   : > { %577 = vmax.xlane.f32.xlu0 %v576_v56  ;;  %v571_v22 = vsel %vm3347_vm14, -inf, %v567_v17  ;;  %v582_v23 = vsel %vm341_vm0, %v572_v21, -inf }
 0x189   : > { %v579_v24 = vsel %vm341_vm0, %v571_v22, -inf }
 0x18b   : > { %501 = vadd.xlane.f32.xlu1 %v500_v61 }
 0x18c   : > { %574 = vmax.xlane.f32.xlu0 %v573_v63 }
 0x18f   : > { %510 = vadd.xlane.f32.xlu1 %v509_v4 }
 0x190   : > { %507 = vadd.xlane.f32.xlu0 %v506_v11 }
 0x193   : > { %494 = vmax.xlane.f32.xlu1 %v493_v19 }
 0x194   : > { %491 = vmax.xlane.f32.xlu0 %v490_v20 }
 0x197   : > { %583 = vmax.xlane.f32.xlu1 %v582_v23 }
 0x198   : > { %580 = vmax.xlane.f32.xlu0 %v579_v24 }
 0x210   : > { %v505_v25 = vpop.xlane.xlu1 %504 }
 0x211   : > { %v486_v26 = vpop.xlane.xlu0 %485  ;;  %v513_v40 = vmul.f32 0.03125, %v505_v25 }
 0x214   : > { %v489_v27 = vpop.xlane.xlu1 %488 }
 0x215   : > { %v578_v29 = vpop.xlane.xlu0 %577  ;;  %v3361_v46 = vsub.f32 %v489_v27, %v513_v40 }
 0x216   : > { %v586_v30 = vsub.f32 %v570_v49, %v578_v29 }
 0x217   : > { %v521_v54 = vsel %vm322_vm2, %v3361_v46, -inf }
 0x218   : > { %v591_v31 = vmul.f32 1.442695, %v586_v30  ;;  %v502_v36 = vpop.xlane.xlu1 %501  ;;  %v525_v4 = vsel %vm341_vm0, %v521_v54, -inf }
 0x219   : > { %v512_v37 = vmul.f32 0.03125, %v502_v36  ;;  %v575_v38 = vpop.xlane.xlu0 %574 }
 0x21a   : > { %2665 = vpow2.f32 %v591_v31  ;;  %v585_v39 = vsub.f32 %v569_v59, %v575_v38 }
 0x21b   : > { %v516_v42 = vsub.f32 %v486_v26, %v512_v37 }
 0x21c   : > { %v589_v43 = vmul.f32 1.442695, %v585_v39  ;;  %v511_v44 = vpop.xlane.xlu1 %510 }
 0x21d   : > { %v508_v45 = vpop.xlane.xlu0 %507  ;;  %v515_v47 = vmul.f32 0.03125, %v511_v44  ;;  %v520_v48 = vsel %vm321_vm15, %v516_v42, -inf }
 0x21e   : > { %2667 = vpow2.f32 %v589_v43  ;;  %v514_v49 = vmul.f32 0.03125, %v508_v45  ;;  %v524_v57 = vsel %vm341_vm0, %v520_v48, -inf  ;;  %v2930_v43 = vmov 0.0   ;;  %v3423_v48 = vld [vmem:[%s3214_s19] sm:$0xff] }
 0x21f   : > { %v528_v17 = vmax.f32 %v524_v57, %v525_v4 }
 0x220   : > { %v495_v50 = vpop.xlane.xlu1 %494 }
 0x221   : > { %v3370_v51 = vsub.f32 %v495_v50, %v515_v47  ;;  %v492_v52 = vpop.xlane.xlu0 %491  ;;  %v3410_v47 = vpack.i.bf16 %v3238_v5, %v3233_v3  ;;  %v3429_v3 = vld [vmem:[%s3214_s19 + $0x10] sm:$0xff]  ;;  %v3434_v50 = vld [vmem:[%s3214_s19 + $0x18] sm:$0xff] }
 0x222   : > { %v518_v56 = vsub.f32 %v492_v52, %v514_v49  ;;  %v3426_v49 = vld [vmem:[%s3214_s19 + $0x8] sm:$0xff]  ;;  %v2464_v52 = vpack.c.bf16 %v3434_v50, %v3429_v3 }
 0x223   : > { %v523_v59 = vsel %vm3988_vm3, %v3370_v51, -inf  ;;  %v2460_v5 = vpack.c.bf16 %v3426_v49, %v3423_v48 }
 0x224   : > { %v3383_v60 = vpop.eup %2665  ;;  %v527_v61 = vsel %vm341_vm0, %v523_v59, -inf  ;;  %v522_v62 = vsel %vm3987_vm4, %v518_v56, -inf  ;;  %v584_v63 = vpop.xlane.xlu1 %583 }
 0x225   : > { %v526_v11 = vsel %vm341_vm0, %v522_v62, -inf  ;;  %v588_v13 = vsub.f32 %v572_v21, %v584_v63  ;;  %v581_v14 = vpop.xlane.xlu0 %580  ;;  %v600_v15 = vsel %vm341_vm0, %v3383_v60, 0.0  ;;  %2461 = vmatprep.subr.bf16.mxu1 %v2460_v5 }
 0x226   : > { %v529_v19 = vmax.f32 %v526_v11, %v527_v61  ;;  %v587_v20 = vsub.f32 %v571_v22, %v581_v14  ;;  %601 = vadd.xlane.f32.xlu1 %v600_v15  ;;  %2463 = vmatpush3.bf16.msra.mxu1 %v2460_v5  ;;  %v2932_v14 = vmov 1.0  }
 0x227   : > { %v595_v23 = vmul.f32 1.442695, %v588_v13  ;;  %2465 = vmatprep.subr.bf16.mxu1 %v2464_v52  ;;  %v3455_v15 = vsel %vm3303_vm10, 0.0, %v2932_v14 }
 0x228   : > { %v3393_v24 = vpop.eup %2667  ;;  %v530_v25 = vmax.f32 %v528_v17, %v529_v19  ;;  %v593_v26 = vmul.f32 1.442695, %v587_v20 }
 0x229   : > { %2669 = vpow2.f32 %v595_v23  ;;  %v597_v27 = vsel %vm341_vm0, %v3393_v24, 0.0 }
 0x22a   : > { %v531_v29 = vrot.slane %v530_v25, 4  ;;  %2671 = vpow2.f32 %v593_v26  ;;  %598 = vadd.xlane.f32.xlu0 %v597_v27  ;;  %2467 = vmatpush3.bf16.msra.mxu1 %v2464_v52  ;;  %v3464_v52 = vsel %vm3289_vm9, 0.0, %v2932_v14 }
 0x22c   : > { %v532_v21 = vmax.f32 %v530_v25, %v531_v29 }
 0x22e   : > { %v533_v30 = vrot.slane %v532_v21, 2 }
 0x230   : > { %v534_v31 = vmax.f32 %v532_v21, %v533_v30 }
 0x232   : > { %v535_v36 = vrot.slane %v534_v31, 1 }
 0x233   : > { %v3397_v37 = vpop.eup %2669 }
 0x234   : > { %v3399_v22 = vpop.eup %2671  ;;  %v606_v38 = vsel %vm341_vm0, %v3397_v37, 0.0  ;;  %v536_v39 = vmax.f32 %v534_v31, %v535_v36 }
 0x235   : > { %607 = vadd.xlane.f32.xlu1 %v606_v38  ;;  %v603_v40 = vsel %vm341_vm0, %v3399_v22, 0.0 }
 0x236   : > { %604 = vadd.xlane.f32.xlu0 %v603_v40  ;;  %vm537_vm5 = vcmp.gt.f32.partialorder %v536_v39, %v516_v42  ;;  %vm540_vm6 = vcmp.gt.f32.partialorder %v536_v39, %v3370_v51  ;;  %v3418_v42 = vpack.i.bf16 %v3230_v2, %v3227_v1  ;;  %vm539_vm4 = vcmp.gt.f32.partialorder %v536_v39, %v518_v56 }
 0x237   : > { %v2207_v44 = vsel %vm537_vm5, 1.0, %v2930_v43  ;;  %vm538_vm5 = vcmp.gt.f32.partialorder %v536_v39, %v3361_v46  ;;  %v2209_v2 = vsel %vm539_vm4, 1.0, %v2930_v43  ;;  %v2210_v46 = vsel %vm540_vm6, 1.0, %v2930_v43 }
 0x238   : > { %v549_v45 = vsel %vm341_vm0, %v2207_v44, 0.0  ;;  %v2208_v1 = vsel %vm538_vm5, 1.0, %v2930_v43  ;;  %v555_v57 = vsel %vm341_vm0, %v2209_v2, 0.0  ;;  %v558_v56 = vsel %vm341_vm0, %v2210_v46, 0.0 }
 0x239   : > { %v552_v54 = vsel %vm341_vm0, %v2208_v1, 0.0 }
 0x23a   : > { %550 = vadd.xlane.f32.xlu0 %v549_v45 }
 0x246   : > { %2611 = vrot.lane.b32.xlu1 %v3410_v47, %s2931_s11 }
 0x24a   : > { %758 = vrot.lane.b32.xlu1 %v3241_v6, %s2931_s11 }
 0x250   : > { %2606 = vrot.lane.b32.xlu0 %v3418_v42, %s2931_s11 }
 0x26e   : > { %553 = vadd.xlane.f32.xlu1 %v552_v54  ;;  %v3469_v54 = vsel %vm3347_vm14, 0.0, %v2932_v14 }
 0x26f   : > { %556 = vadd.xlane.f32.xlu0 %v555_v57 }
 0x27f   : > { %760 = vrot.lane.b32.xlu1 %v3256_v8, %s2931_s11 }
 0x285   : > { %762 = vrot.lane.b32.xlu0 %v3259_v9, %s2931_s11 }
 0x2a3   : > { %559 = vadd.xlane.f32.xlu1 %v558_v56 }
 0x2b3   : > { %v602_v26 = vpop.xlane.xlu1 %601 }
 0x2b4   : > { %764 = vrot.lane.b32.xlu1 %v3266_v10, %s2931_s11 }
 0x2b7   : > { %v599_v59 = vpop.xlane.xlu0 %598 }
 0x2b8   : > { %2673 = vrcp.f32 %v599_v59 }
 0x2b9   : > { %2675 = vrcp.f32 %v602_v26 }
 0x2c2   : > { %v2674_v61 = vpop.eup %2673  ;;  %v608_v27 = vpop.xlane.xlu1 %607 }
 0x2c3   : > { %v613_v62 = vmul.f32 %v2674_v61, %v599_v59  ;;  %v605_v63 = vpop.xlane.xlu0 %604  ;;  %v2676_v29 = vpop.eup %2675 }
 0x2c4   : > { %2677 = vrcp.f32 %v605_v63  ;;  %v614_v30 = vmul.f32 %v2676_v29, %v602_v26 }
 0x2c5   : > { %v617_v4 = vsub.f32 2.0, %v613_v62  ;;  %2679 = vrcp.f32 %v608_v27 }
 0x2c6   : > { %v2612_v31 = vpop.permute.xlu1 %2611  ;;  %v618_v36 = vsub.f32 2.0, %v614_v30 }
 0x2c7   : > { %v621_v11 = vmul.f32 %v2674_v61, %v617_v4  ;;  %v551_v13 = vpop.xlane.xlu0 %550  ;;  %v2614_v45 = vunpack.i.h.bf16 %v2612_v31  ;;  %v2613_v5 = vunpack.i.l.bf16 %v2612_v31 }
 0x2c8   : > { %vm561_vm4 = vcmp.lt.f32.partialorder %v551_v13, 20.0  ;;  %v622_v39 = vmul.f32 %v2676_v29, %v618_v36 }
 0x2c9   : > { %v625_v51 = vmul.f32 %v3393_v24, %v621_v11  ;;  %v2474_v59 = vpack.c.bf16 %v2614_v45, %v2613_v5  ;;  %v3484_v11 = vsel %vm3341_vm13, 0.0, %v2932_v14 }
 0x2ca   : > { %v759_v40 = vpop.permute.xlu1 %758  ;;  %v626_v1 = vmul.f32 %v3383_v60, %v622_v39 }
 0x2cb   : > { %v637_v17 = vsel %vm561_vm4, %v625_v51, %v3455_v15  ;;  %v2607_v19 = vpop.permute.xlu0 %2606 }
 0x2cc   : > { %2358 = vmatprep.mubr.msk.f32.mxu1 %vm341_vm0, %v637_v17  ;;  %v2609_v20 = vunpack.i.h.bf16 %v2607_v19  ;;  %v2608_v23 = vunpack.i.l.bf16 %v2607_v19 }
 0x2ce   : > { %v2468_v25 = vpack.c.bf16 %v2609_v20, %v2608_v23  ;;  %v2678_v21 = vpop.eup %2677 }
 0x2cf   : > { %v615_v24 = vmul.f32 %v2678_v21, %v605_v63  ;;  %v2680_v60 = vpop.eup %2679 }
 0x2d0   : > { %2470 = vmatprep.subr.msk.bf16.mxu1 %vm3222_vm1, %v2468_v25 }
 0x2d1   : > { %v619_v38 = vsub.f32 2.0, %v615_v24 }
 0x2d3   : > { %v623_v44 = vmul.f32 %v2678_v21, %v619_v38 }
 0x2d5   : > { %v627_v57 = vmul.f32 %v3399_v22, %v623_v44  ;;  %v616_v22 = vmul.f32 %v2680_v60, %v608_v27 }
 0x2d7   : > { %v620_v62 = vsub.f32 2.0, %v616_v22 }
 0x2d9   : > { %v624_v63 = vmul.f32 %v2680_v60, %v620_v62 }
 0x2db   : > { %v628_v13 = vmul.f32 %v3397_v37, %v624_v63 }
 0x2fb   : > { %v554_v2 = vpop.xlane.xlu1 %553 }
 0x2fc   : > { %vm562_vm6 = vcmp.lt.f32.partialorder %v554_v2, 20.0  ;;  %v557_v46 = vpop.xlane.xlu0 %556 }
 0x2fd   : > { %v638_v56 = vsel %vm562_vm6, %v626_v1, %v3464_v52  ;;  %vm563_vm5 = vcmp.lt.f32.partialorder %v557_v46, 20.0  ;;  %vm4033_vm6 = vcmp.eq.s32.totalorder %v3275_v33, %v3333_v12 }
 0x2fe   : > { %v639_v61 = vsel %vm563_vm5, %v627_v57, %v3469_v54  ;;  %2359 = vmatmul.mubr.msk.f32.vlgmr.msra.gmra.mrb[0].mxu1 %vm341_vm0, %v638_v56 }
 0x2ff   : > { %2473 = vmatpush3.bf16.xpose.msk.msra.mxu1 %vm3222_vm1, %v2468_v25  ;;  %2361 = vmatprep.mubr.msk.f32.mxu1 %vm341_vm0, %v639_v61  ;;  %v761_v4 = vpop.permute.xlu1 %760 }
 0x300   : > { %2476 = vmatprep.subr.msk.bf16.mxu1 %vm3222_vm1, %v2474_v59  ;;  %v763_v19 = vpop.permute.xlu0 %762 }
 0x307   : > { %2479 = vmatpush3.bf16.xpose.msk.msra.mxu1 %vm3222_vm1, %v2474_v59 }
 0x330   : > { %v560_v51 = vpop.xlane.xlu1 %559 }
 0x331   : > { %vm564_vm4 = vcmp.lt.f32.partialorder %v560_v51, 20.0 }
 0x332   : > { %v640_v17 = vsel %vm564_vm4, %v628_v13, %v3484_v11 }
 0x333   : > { %2362 = vmatmul.mubr.msk.f32.gmra.mrb[2].mxu1 %vm341_vm0, %v640_v17 }
 0x334   : > { %2372 = vmatprep.mubr.msk.f32.mxu1 %vm341_vm0, %v759_v40  ;;  %v765_v20 = vpop.permute.xlu1 %764 }
 0x337   : > { %2373 = vmatmul.mubr.msk.f32.vlgmr.msra.gmra.mrb[4].mxu1 %vm341_vm0, %v761_v4 }
 0x338   : > { %2375 = vmatprep.mubr.msk.f32.mxu1 %vm341_vm0, %v763_v19 }
 0x33b   : > { %2376 = vmatmul.mubr.msk.f32.gmra.mrb[6].mxu1 %vm341_vm0, %v765_v20 }
 0x3d1   : > { %v2360_v14 = vpop.f32.mrb[0].mxu1 }
 0x3d2   : > { %739 = vst.msk [vmem:[%s3494_s22 + $0x8] sm:$0xff] %vm341_vm0, %v2360_v14  ;;  %v719_v37 = vpop.f32.mrb[1].mxu1 }
 0x3d3   : > { %738 = vst.msk [vmem:[%s3494_s22] sm:$0xff] %vm341_vm0, %v719_v37  ;;  %v3542_v37 = vpack.i.bf16 %v3434_v50, %v3429_v3 }
 0x406   : > { %v2363_v23 = vpop.f32.mrb[2].mxu1 }
 0x407   : > { %741 = vst.msk [vmem:[%s3494_s22 + $0x18] sm:$0xff] %vm341_vm0, %v2363_v23  ;;  %v729_v25 = vpop.f32.mrb[3].mxu1  ;;  %v3548_v23 = vpack.i.bf16 %v3426_v49, %v3423_v48 }
 0x408   : > { %740 = vst.msk [vmem:[%s3494_s22 + $0x10] sm:$0xff] %vm341_vm0, %v729_v25 }
 0x40a   : > { %v2374_v26 = vpop.f32.mrb[4].mxu1 }
 0x40b   : > { %v860_v27 = vpop.f32.mrb[5].mxu1  ;;  %v896_v29 = vsel %vm3277_vm7, %v2374_v26, 0.0  ;;  %v880_v21 = vsel %vm3277_vm7, %v2374_v26, -inf  ;;  %v965_v30 = vmul.f32 0.17677669, %v2374_v26 }
 0x40c   : > { %v902_v24 = vsel %vm341_vm0, %v896_v29, 0.0  ;;  %v886_v31 = vsel %vm341_vm0, %v880_v21, -inf  ;;  %v895_v38 = vsel %vm3281_vm8, %v860_v27, 0.0  ;;  %v879_v1 = vsel %vm3281_vm8, %v860_v27, -inf }
 0x40d   : > { %903 = vadd.xlane.f32.xlu0 %v902_v24  ;;  %887 = vmax.xlane.f32.xlu1 %v886_v31  ;;  %v969_v36 = vsel %vm3289_vm9, -inf, %v965_v30  ;;  %v899_v5 = vsel %vm341_vm0, %v895_v38, 0.0  ;;  %v964_v2 = vmul.f32 0.17677669, %v860_v27  ;;  %v883_v46 = vsel %vm341_vm0, %v879_v1, -inf }
 0x40e   : > { %v2377_v39 = vpop.f32.mrb[6].mxu1  ;;  %v975_v45 = vsel %vm341_vm0, %v969_v36, -inf }
 0x40f   : > { %v870_v40 = vpop.f32.mrb[7].mxu1  ;;  %v898_v44 = vsel %vm3308_vm11, %v2377_v39, 0.0  ;;  %v968_v56 = vsel %vm3303_vm10, -inf, %v964_v2  ;;  %v882_v59 = vsel %vm3308_vm11, %v2377_v39, -inf  ;;  %v967_v61 = vmul.f32 0.17677669, %v2377_v39 }
 0x410   : > { %v908_v57 = vsel %vm341_vm0, %v898_v44, 0.0  ;;  %v972_v60 = vsel %vm341_vm0, %v968_v56, -inf  ;;  %v892_v22 = vsel %vm341_vm0, %v882_v59, -inf  ;;  %v897_v63 = vsel %vm3315_vm12, %v870_v40, 0.0 }
 0x411   : > { %976 = vmax.xlane.f32.xlu1 %v975_v45  ;;  %900 = vadd.xlane.f32.xlu0 %v899_v5  ;;  %v971_v62 = vsel %vm3341_vm13, -inf, %v967_v61  ;;  %v905_v13 = vsel %vm341_vm0, %v897_v63, 0.0  ;;  %v881_v51 = vsel %vm3315_vm12, %v870_v40, -inf  ;;  %v966_v17 = vmul.f32 0.17677669, %v870_v40 }
 0x412   : > { %v981_v4 = vsel %vm341_vm0, %v971_v62, -inf  ;;  %v889_v19 = vsel %vm341_vm0, %v881_v51, -inf }
 0x413   : > { %v970_v20 = vsel %vm3347_vm14, -inf, %v966_v17 }
 0x414   : > { %v978_v14 = vsel %vm341_vm0, %v970_v20, -inf }
 0x415   : > { %884 = vmax.xlane.f32.xlu0 %v883_v46  ;;  %909 = vadd.xlane.f32.xlu1 %v908_v57 }
 0x419   : > { %973 = vmax.xlane.f32.xlu0 %v972_v60  ;;  %893 = vmax.xlane.f32.xlu1 %v892_v22 }
 0x41d   : > { %982 = vmax.xlane.f32.xlu1 %v981_v4  ;;  %906 = vadd.xlane.f32.xlu0 %v905_v13 }
 0x421   : > { %890 = vmax.xlane.f32.xlu0 %v889_v19 }
 0x425   : > { %979 = vmax.xlane.f32.xlu0 %v978_v14 }
 0x42e   : > { %2621 = vrot.lane.b32.xlu1 %v3542_v37, %s2931_s11 }
 0x43b   : > { %2616 = vrot.lane.b32.xlu0 %v3548_v23, %s2931_s11 }
 0x49a   : > { %v904_v25 = vpop.xlane.xlu0 %903  ;;  %v888_v26 = vpop.xlane.xlu1 %887 }
 0x49b   : > { %v912_v38 = vmul.f32 0.03125, %v904_v25 }
 0x49d   : > { %v3552_v1 = vsub.f32 %v888_v26, %v912_v38 }
 0x49e   : > { %v977_v27 = vpop.xlane.xlu1 %976  ;;  %v901_v29 = vpop.xlane.xlu0 %900 }
 0x49f   : > { %v985_v21 = vsub.f32 %v969_v36, %v977_v27  ;;  %v911_v39 = vmul.f32 0.03125, %v901_v29  ;;  %v920_v22 = vsel %vm322_vm2, %v3552_v1, -inf }
 0x4a0   : > { %v924_v51 = vsel %vm341_vm0, %v920_v22, -inf }
 0x4a1   : > { %v990_v30 = vmul.f32 1.442695, %v985_v21 }
 0x4a2   : > { %v885_v24 = vpop.xlane.xlu0 %884  ;;  %v910_v31 = vpop.xlane.xlu1 %909 }
 0x4a3   : > { %2681 = vpow2.f32 %v990_v30  ;;  %v915_v44 = vsub.f32 %v885_v24, %v911_v39  ;;  %v914_v48 = vmul.f32 0.03125, %v910_v31 }
 0x4a5   : > { %v919_v46 = vsel %vm321_vm15, %v915_v44, -inf }
 0x4a6   : > { %v974_v3 = vpop.xlane.xlu0 %973  ;;  %v894_v50 = vpop.xlane.xlu1 %893  ;;  %v923_v4 = vsel %vm341_vm0, %v919_v46, -inf }
 0x4a7   : > { %v984_v40 = vsub.f32 %v968_v56, %v974_v3  ;;  %v3554_v2 = vsub.f32 %v894_v50, %v914_v48  ;;  %v927_v26 = vmax.f32 %v923_v4, %v924_v51 }
 0x4a9   : > { %v988_v49 = vmul.f32 1.442695, %v984_v40 }
 0x4aa   : > { %v983_v45 = vpop.xlane.xlu1 %982  ;;  %v907_v5 = vpop.xlane.xlu0 %906 }
 0x4ab   : > { %2683 = vpow2.f32 %v988_v49  ;;  %v987_v36 = vsub.f32 %v971_v62, %v983_v45  ;;  %v913_v61 = vmul.f32 0.03125, %v907_v5  ;;  %v922_v62 = vsel %vm3988_vm3, %v3554_v2, -inf }
 0x4ac   : > { %v926_v17 = vsel %vm341_vm0, %v922_v62, -inf }
 0x4ad   : > { %v3556_v57 = vpop.eup %2681  ;;  %v994_v59 = vmul.f32 1.442695, %v987_v36 }
 0x4ae   : > { %v891_v56 = vpop.xlane.xlu0 %890  ;;  %v999_v60 = vsel %vm341_vm0, %v3556_v57, 0.0  ;;  %v2622_v25 = vpop.permute.xlu1 %2621 }
 0x4af   : > { %2685 = vpow2.f32 %v994_v59  ;;  %v917_v63 = vsub.f32 %v891_v56, %v913_v61  ;;  %1000 = vadd.xlane.f32.xlu1 %v999_v60  ;;  %v2624_v31 = vunpack.i.h.bf16 %v2622_v25  ;;  %v2623_v3 = vunpack.i.l.bf16 %v2622_v25 }
 0x4b1   : > { %v921_v13 = vsel %vm4033_vm6, %v917_v63, -inf  ;;  %v2484_v36 = vpack.c.bf16 %v2624_v31, %v2623_v3 }
 0x4b2   : > { %v925_v19 = vsel %vm341_vm0, %v921_v13, -inf  ;;  %v980_v14 = vpop.xlane.xlu0 %979 }
 0x4b3   : > { %v928_v27 = vmax.f32 %v925_v19, %v926_v17  ;;  %v986_v29 = vsub.f32 %v970_v20, %v980_v14 }
 0x4b5   : > { %v2684_v21 = vpop.eup %2683  ;;  %v929_v30 = vmax.f32 %v927_v26, %v928_v27  ;;  %v992_v24 = vmul.f32 1.442695, %v986_v29 }
 0x4b6   : > { %v996_v50 = vsel %vm341_vm0, %v2684_v21, 0.0  ;;  %v2617_v38 = vpop.permute.xlu0 %2616 }
 0x4b7   : > { %v930_v39 = vrot.slane %v929_v30, 4  ;;  %2687 = vpow2.f32 %v992_v24  ;;  %997 = vadd.xlane.f32.xlu0 %v996_v50  ;;  %v2619_v40 = vunpack.i.h.bf16 %v2617_v38  ;;  %v2618_v48 = vunpack.i.l.bf16 %v2617_v38 }
 0x4b9   : > { %v3579_v49 = vpop.eup %2685  ;;  %v931_v45 = vmax.f32 %v929_v30, %v930_v39  ;;  %v2480_v5 = vpack.c.bf16 %v2619_v40, %v2618_v48 }
 0x4ba   : > { %v1005_v20 = vsel %vm341_vm0, %v3579_v49, 0.0 }
 0x4bb   : > { %v932_v46 = vrot.slane %v931_v45, 2  ;;  %1006 = vadd.xlane.f32.xlu1 %v1005_v20  ;;  %2481 = vmatprep.subr.bf16.mxu0 %v2480_v5 }
 0x4bc   : > { %2483 = vmatpush3.bf16.msra.mxu0 %v2480_v5 }
 0x4bd   : > { %v933_v59 = vmax.f32 %v931_v45, %v932_v46  ;;  %2485 = vmatprep.subr.bf16.mxu0 %v2484_v36 }
 0x4bf   : > { %v934_v61 = vrot.slane %v933_v59, 1 }
 0x4c0   : > { %2487 = vmatpush3.bf16.msra.mxu0 %v2484_v36 }
 0x4c1   : > { %v3583_v56 = vpop.eup %2687  ;;  %v935_v60 = vmax.f32 %v933_v59, %v934_v61 }
 0x4c2   : > { %v1002_v22 = vsel %vm341_vm0, %v3583_v56, 0.0 }
 0x4c3   : > { %1003 = vadd.xlane.f32.xlu0 %v1002_v22  ;;  %vm936_vm5 = vcmp.gt.f32.partialorder %v935_v60, %v915_v44  ;;  %vm938_vm4 = vcmp.gt.f32.partialorder %v935_v60, %v917_v63  ;;  %vm937_vm6 = vcmp.gt.f32.partialorder %v935_v60, %v3552_v1 }
 0x4c4   : > { %v2223_v62 = vsel %vm936_vm5, 1.0, %v2930_v43  ;;  %v2224_v44 = vsel %vm937_vm6, 1.0, %v2930_v43  ;;  %vm939_vm5 = vcmp.gt.f32.partialorder %v935_v60, %v3554_v2 }
 0x4c5   : > { %v948_v4 = vsel %vm341_vm0, %v2223_v62, 0.0  ;;  %v951_v13 = vsel %vm341_vm0, %v2224_v44, 0.0  ;;  %v2226_v51 = vsel %vm939_vm5, 1.0, %v2930_v43 }
 0x4c6   : > { %v957_v17 = vsel %vm341_vm0, %v2226_v51, 0.0 }
 0x4c7   : > { %949 = vadd.xlane.f32.xlu0 %v948_v4 }
 0x4cc   : > { %2631 = vrot.lane.b32.xlu1 %v3410_v47, %s2933_s7 }
 0x4d0   : > { %1190 = vrot.lane.b32.xlu1 %v3241_v6, %s2933_s7  ;;  %v2225_v6 = vsel %vm938_vm4, 1.0, %v2930_v43 }
 0x4d1   : > { %v954_v47 = vsel %vm341_vm0, %v2225_v6, 0.0 }
 0x4dd   : > { %2626 = vrot.lane.b32.xlu0 %v3418_v42, %s2933_s7 }
 0x4f4   : > { %952 = vadd.xlane.f32.xlu1 %v951_v13 }
 0x4fc   : > { %958 = vadd.xlane.f32.xlu0 %v957_v17 }
 0x505   : > { %1192 = vrot.lane.b32.xlu1 %v3256_v8, %s2933_s7 }
 0x512   : > { %1194 = vrot.lane.b32.xlu0 %v3259_v9, %s2933_s7 }
 0x529   : > { %955 = vadd.xlane.f32.xlu1 %v954_v47 }
 0x53a   : > { %1196 = vrot.lane.b32.xlu1 %v3266_v10, %s2933_s7 }
 0x53c   : > { %v1001_v10 = vpop.xlane.xlu1 %1000 }
 0x544   : > { %v998_v42 = vpop.xlane.xlu0 %997 }
 0x545   : > { %2689 = vrcp.f32 %v998_v42 }
 0x546   : > { %2691 = vrcp.f32 %v1001_v10 }
 0x548   : > { %v1007_v24 = vpop.xlane.xlu1 %1006 }
 0x54c   : > { %v2632_v50 = vpop.permute.xlu1 %2631 }
 0x54d   : > { %v2634_v40 = vunpack.i.h.bf16 %v2632_v50  ;;  %v2633_v48 = vunpack.i.l.bf16 %v2632_v50 }
 0x54f   : > { %v2690_v1 = vpop.eup %2689  ;;  %v2494_v20 = vpack.c.bf16 %v2634_v40, %v2633_v48 }
 0x550   : > { %v1012_v2 = vmul.f32 %v2690_v1, %v998_v42  ;;  %v1004_v19 = vpop.xlane.xlu0 %1003  ;;  %v2692_v31 = vpop.eup %2691 }
 0x551   : > { %v1013_v3 = vmul.f32 %v2692_v31, %v1001_v10  ;;  %v1191_v39 = vpop.permute.xlu1 %1190  ;;  %2693 = vrcp.f32 %v1004_v19 }
 0x552   : > { %v1016_v14 = vsub.f32 2.0, %v1012_v2  ;;  %2695 = vrcp.f32 %v1007_v24 }
 0x553   : > { %v1017_v38 = vsub.f32 2.0, %v1013_v3 }
 0x554   : > { %v1020_v25 = vmul.f32 %v2690_v1, %v1016_v14  ;;  %v950_v8 = vpop.xlane.xlu0 %949 }
 0x555   : > { %vm960_vm6 = vcmp.lt.f32.partialorder %v950_v8, 20.0 }
 0x556   : > { %v1024_v26 = vmul.f32 %v2684_v21, %v1020_v25  ;;  %v1021_v21 = vmul.f32 %v2692_v31, %v1017_v38 }
 0x558   : > { %v1036_v9 = vsel %vm960_vm6, %v1024_v26, %v3455_v15  ;;  %v2627_v63 = vpop.permute.xlu0 %2626  ;;  %v1025_v45 = vmul.f32 %v3556_v57, %v1021_v21 }
 0x559   : > { %2386 = vmatprep.mubr.msk.f32.mxu0 %vm341_vm0, %v1036_v9  ;;  %v2629_v27 = vunpack.i.h.bf16 %v2627_v63  ;;  %v2628_v29 = vunpack.i.l.bf16 %v2627_v63 }
 0x55b   : > { %v2488_v30 = vpack.c.bf16 %v2629_v27, %v2628_v29  ;;  %v2694_v46 = vpop.eup %2693 }
 0x55c   : > { %v2696_v57 = vpop.eup %2695  ;;  %v1014_v59 = vmul.f32 %v2694_v46, %v1004_v19 }
 0x55d   : > { %2490 = vmatprep.subr.msk.bf16.mxu0 %vm3222_vm1, %v2488_v30  ;;  %v1015_v61 = vmul.f32 %v2696_v57, %v1007_v24 }
 0x55e   : > { %v1018_v60 = vsub.f32 2.0, %v1014_v59 }
 0x55f   : > { %v1019_v22 = vsub.f32 2.0, %v1015_v61 }
 0x560   : > { %v1022_v62 = vmul.f32 %v2694_v46, %v1018_v60 }
 0x561   : > { %v1023_v44 = vmul.f32 %v2696_v57, %v1019_v22 }
 0x562   : > { %v1026_v51 = vmul.f32 %v3583_v56, %v1022_v62 }
 0x563   : > { %v1027_v6 = vmul.f32 %v3579_v49, %v1023_v44 }
 0x581   : > { %v953_v5 = vpop.xlane.xlu1 %952 }
 0x582   : > { %vm961_vm4 = vcmp.lt.f32.partialorder %v953_v5, 20.0 }
 0x583   : > { %v1037_v36 = vsel %vm961_vm4, %v1025_v45, %v3464_v52  ;;  %vm4034_vm4 = vcmp.eq.s32.totalorder %v3275_v33, %v3333_v12 }
 0x584   : > { %2387 = vmatmul.mubr.msk.f32.vlgmr.msra.gmra.mrb[4].mxu0 %vm341_vm0, %v1037_v36 }
 0x585   : > { %2493 = vmatpush3.bf16.xpose.msk.msra.mxu0 %vm3222_vm1, %v2488_v30  ;;  %v1193_v4 = vpop.permute.xlu1 %1192 }
 0x586   : > { %2496 = vmatprep.subr.msk.bf16.mxu0 %vm3222_vm1, %v2494_v20 }
 0x589   : > { %v959_v13 = vpop.xlane.xlu0 %958 }
 0x58a   : > { %vm963_vm5 = vcmp.lt.f32.partialorder %v959_v13, 20.0 }
 0x58b   : > { %v1039_v42 = vsel %vm963_vm5, %v1027_v6, %v3484_v11 }
 0x58d   : > { %2499 = vmatpush3.bf16.xpose.msk.msra.mxu0 %vm3222_vm1, %v2494_v20  ;;  %v1195_v1 = vpop.permute.xlu0 %1194 }
 0x5b6   : > { %v956_v17 = vpop.xlane.xlu1 %955 }
 0x5b7   : > { %vm962_vm6 = vcmp.lt.f32.partialorder %v956_v17, 20.0 }
 0x5b8   : > { %v1038_v47 = vsel %vm962_vm6, %v1026_v51, %v3469_v54 }
 0x5b9   : > { %2389 = vmatprep.mubr.msk.f32.mxu0 %vm341_vm0, %v1038_v47 }
 0x5ba   : > { %2390 = vmatmul.mubr.msk.f32.gmra.mrb[6].mxu0 %vm341_vm0, %v1039_v42  ;;  %v1197_v2 = vpop.permute.xlu1 %1196 }
 0x5bb   : > { %2400 = vmatprep.mubr.msk.f32.mxu0 %vm341_vm0, %v1191_v39 }
 0x5be   : > { %2401 = vmatmul.mubr.msk.f32.vlgmr.msra.gmra.mrb[8].mxu0 %vm341_vm0, %v1193_v4 }
 0x5bf   : > { %2403 = vmatprep.mubr.msk.f32.mxu0 %vm341_vm0, %v1195_v1 }
 0x5c2   : > { %2404 = vmatmul.mubr.msk.f32.gmra.mrb[10].mxu0 %vm341_vm0, %v1197_v2 }
 0x657   : > { %v3633_v49 = vpop.f32.mrb[4].mxu0 }
 0x658   : > { %v3635_v56 = vpop.f32.mrb[5].mxu0 }
 0x68d   : > { %v3637_v19 = vpop.f32.mrb[6].mxu0 }
 0x68e   : > { %v3639_v14 = vpop.f32.mrb[7].mxu0 }
 0x691   : > { %v2402_v25 = vpop.f32.mrb[8].mxu0 }
 0x692   : > { %v1292_v8 = vpop.f32.mrb[9].mxu0  ;;  %v1328_v26 = vsel %vm3277_vm7, %v2402_v25, 0.0  ;;  %v1312_v9 = vsel %vm3277_vm7, %v2402_v25, -inf  ;;  %v1397_v63 = vmul.f32 0.17677669, %v2402_v25 }
 0x693   : > { %v1334_v27 = vsel %vm341_vm0, %v1328_v26, 0.0  ;;  %v1318_v29 = vsel %vm341_vm0, %v1312_v9, -inf  ;;  %v1327_v10 = vsel %vm3281_vm8, %v1292_v8, 0.0  ;;  %v1311_v21 = vsel %vm3281_vm8, %v1292_v8, -inf }
 0x694   : > { %1335 = vadd.xlane.f32.xlu0 %v1334_v27  ;;  %1319 = vmax.xlane.f32.xlu1 %v1318_v29  ;;  %v1401_v30 = vsel %vm3289_vm9, -inf, %v1397_v63  ;;  %v1331_v38 = vsel %vm341_vm0, %v1327_v10, 0.0  ;;  %v1396_v39 = vmul.f32 0.17677669, %v1292_v8  ;;  %v1315_v48 = vsel %vm341_vm0, %v1311_v21, -inf }
 0x695   : > { %v2405_v24 = vpop.f32.mrb[10].mxu0  ;;  %v1407_v50 = vsel %vm341_vm0, %v1401_v30, -inf }
 0x696   : > { %v1302_v31 = vpop.f32.mrb[11].mxu0  ;;  %v1330_v3 = vsel %vm3308_vm11, %v2405_v24, 0.0  ;;  %v1400_v45 = vsel %vm3303_vm10, -inf, %v1396_v39  ;;  %v1314_v5 = vsel %vm3308_vm11, %v2405_v24, -inf  ;;  %v1399_v36 = vmul.f32 0.17677669, %v2405_v24 }
 0x697   : > { %v1340_v40 = vsel %vm341_vm0, %v1330_v3, 0.0  ;;  %v1404_v20 = vsel %vm341_vm0, %v1400_v45, -inf  ;;  %v1324_v46 = vsel %vm341_vm0, %v1314_v5, -inf  ;;  %v1329_v59 = vsel %vm3315_vm12, %v1302_v31, 0.0 }
 0x698   : > { %1408 = vmax.xlane.f32.xlu1 %v1407_v50  ;;  %1332 = vadd.xlane.f32.xlu0 %v1331_v38  ;;  %v1403_v57 = vsel %vm3341_vm13, -inf, %v1399_v36  ;;  %v1337_v60 = vsel %vm341_vm0, %v1329_v59, 0.0  ;;  %v1313_v22 = vsel %vm3315_vm12, %v1302_v31, -inf  ;;  %v1398_v62 = vmul.f32 0.17677669, %v1302_v31 }
 0x699   : > { %v1413_v61 = vsel %vm341_vm0, %v1403_v57, -inf  ;;  %v1321_v4 = vsel %vm341_vm0, %v1313_v22, -inf }
 0x69a   : > { %v1402_v44 = vsel %vm3347_vm14, -inf, %v1398_v62 }
 0x69b   : > { %v1410_v13 = vsel %vm341_vm0, %v1402_v44, -inf }
 0x69c   : > { %1316 = vmax.xlane.f32.xlu0 %v1315_v48  ;;  %1341 = vadd.xlane.f32.xlu1 %v1340_v40 }
 0x6a0   : > { %1405 = vmax.xlane.f32.xlu0 %v1404_v20  ;;  %1325 = vmax.xlane.f32.xlu1 %v1324_v46 }
 0x6a4   : > { %1414 = vmax.xlane.f32.xlu1 %v1413_v61  ;;  %1338 = vadd.xlane.f32.xlu0 %v1337_v60 }
 0x6a8   : > { %1322 = vmax.xlane.f32.xlu0 %v1321_v4 }
 0x6ac   : > { %1411 = vmax.xlane.f32.xlu0 %v1410_v13 }
 0x6b5   : > { %2641 = vrot.lane.b32.xlu1 %v3542_v37, %s2933_s7 }
 0x6c2   : > { %2636 = vrot.lane.b32.xlu0 %v3548_v23, %s2933_s7 }
 0x721   : > { %v1336_v51 = vpop.xlane.xlu0 %1335  ;;  %v1320_v17 = vpop.xlane.xlu1 %1319 }
 0x722   : > { %v1344_v6 = vmul.f32 0.03125, %v1336_v51 }
 0x724   : > { %v3681_v47 = vsub.f32 %v1320_v17, %v1344_v6 }
 0x725   : > { %v1409_v42 = vpop.xlane.xlu1 %1408  ;;  %v1333_v1 = vpop.xlane.xlu0 %1332 }
 0x726   : > { %v1417_v2 = vsub.f32 %v1401_v30, %v1409_v42  ;;  %v1343_v8 = vmul.f32 0.03125, %v1333_v1  ;;  %v1352_v37 = vsel %vm322_vm2, %v3681_v47, -inf }
 0x727   : > { %v1356_v27 = vsel %vm341_vm0, %v1352_v37, -inf }
 0x728   : > { %v1422_v25 = vmul.f32 1.442695, %v1417_v2 }
 0x729   : > { %v1317_v26 = vpop.xlane.xlu0 %1316  ;;  %v1342_v9 = vpop.xlane.xlu1 %1341 }
 0x72a   : > { %2697 = vpow2.f32 %v1422_v25  ;;  %v3687_v63 = vsub.f32 %v1317_v26, %v1343_v8  ;;  %v1346_v31 = vmul.f32 0.03125, %v1342_v9 }
 0x72c   : > { %v1351_v23 = vsel %vm321_vm15, %v3687_v63, -inf }
 0x72d   : > { %v1355_v29 = vsel %vm341_vm0, %v1351_v23, -inf  ;;  %v1406_v30 = vpop.xlane.xlu0 %1405  ;;  %v1326_v10 = vpop.xlane.xlu1 %1325 }
 0x72e   : > { %v1359_v24 = vmax.f32 %v1355_v29, %v1356_v27  ;;  %v1416_v3 = vsub.f32 %v1400_v45, %v1406_v30  ;;  %v3695_v39 = vsub.f32 %v1326_v10, %v1346_v31 }
 0x730   : > { %v1420_v50 = vmul.f32 1.442695, %v1416_v3  ;;  %v1354_v45 = vsel %vm3988_vm3, %v3695_v39, -inf }
 0x731   : > { %v1415_v38 = vpop.xlane.xlu1 %1414  ;;  %v1339_v21 = vpop.xlane.xlu0 %1338  ;;  %v1358_v61 = vsel %vm341_vm0, %v1354_v45, -inf }
 0x732   : > { %2699 = vpow2.f32 %v1420_v50  ;;  %v1419_v40 = vsub.f32 %v1403_v57, %v1415_v38  ;;  %v1345_v36 = vmul.f32 0.03125, %v1339_v21  ;;  %v1612_v38 = vld [vmem:[%s3210_s12 + $0x10] sm:$0xff]  ;;  %v1613_v21 = vld [vmem:[%s3210_s12 + $0x18] sm:$0xff] }
 0x734   : > { %v3697_v48 = vpop.eup %2697  ;;  %v1426_v5 = vmul.f32 1.442695, %v1419_v40  ;;  %v2650_v40 = vpack.i.bf16 %v1613_v21, %v1612_v38 }
 0x735   : > { %v1323_v20 = vpop.xlane.xlu0 %1322  ;;  %v1431_v46 = vsel %vm341_vm0, %v3697_v48, 0.0  ;;  %v2642_v62 = vpop.permute.xlu1 %2641 }
 0x736   : > { %2701 = vpow2.f32 %v1426_v5  ;;  %v1349_v59 = vsub.f32 %v1323_v20, %v1345_v36  ;;  %1432 = vadd.xlane.f32.xlu1 %v1431_v46  ;;  %v2644_v42 = vunpack.i.h.bf16 %v2642_v62  ;;  %v2643_v1 = vunpack.i.l.bf16 %v2642_v62  ;;  %v1606_v5 = vld [vmem:[%s3203_s24] sm:$0xff]  ;;  %v1607_v36 = vld [vmem:[%s3203_s24 + $0x8] sm:$0xff] }
 0x737   : > { %v1610_v20 = vld [vmem:[%s3210_s12] sm:$0xff]  ;;  %v1611_v46 = vld [vmem:[%s3210_s12 + $0x8] sm:$0xff] }
 0x738   : > { %v1353_v57 = vsel %vm4034_vm4, %v1349_v59, -inf  ;;  %v2645_v45 = vpack.i.bf16 %v1611_v46, %v1610_v20 }
 0x739   : > { %v1357_v60 = vsel %vm341_vm0, %v1353_v57, -inf  ;;  %v1412_v22 = vpop.xlane.xlu0 %1411 }
 0x73a   : > { %v1360_v4 = vmax.f32 %v1357_v60, %v1358_v61  ;;  %v1418_v13 = vsub.f32 %v1402_v44, %v1412_v22  ;;  %v2504_v44 = vpack.c.bf16 %v2644_v42, %v2643_v1 }
 0x73c   : > { %v3710_v51 = vpop.eup %2699  ;;  %v1361_v17 = vmax.f32 %v1359_v24, %v1360_v4  ;;  %v1424_v6 = vmul.f32 1.442695, %v1418_v13  ;;  %v1609_v13 = vld [vmem:[%s3203_s24 + $0x18] sm:$0xff] }
 0x73d   : > { %v1428_v2 = vsel %vm341_vm0, %v3710_v51, 0.0  ;;  %v2637_v25 = vpop.permute.xlu0 %2636 }
 0x73e   : > { %v1362_v8 = vrot.slane %v1361_v17, 4  ;;  %2703 = vpow2.f32 %v1424_v6  ;;  %1429 = vadd.xlane.f32.xlu0 %v1428_v2  ;;  %v2639_v26 = vunpack.i.h.bf16 %v2637_v25  ;;  %v2638_v9 = vunpack.i.l.bf16 %v2637_v25 }
 0x740   : > { %v3714_v37 = vpop.eup %2701  ;;  %v1363_v23 = vmax.f32 %v1361_v17, %v1362_v8  ;;  %v2500_v27 = vpack.c.bf16 %v2639_v26, %v2638_v9 }
 0x741   : > { %v1437_v29 = vsel %vm341_vm0, %v3714_v37, 0.0 }
 0x742   : > { %v1364_v30 = vrot.slane %v1363_v23, 2  ;;  %1438 = vadd.xlane.f32.xlu1 %v1437_v29  ;;  %2501 = vmatprep.subr.bf16.mxu1 %v2500_v27 }
 0x743   : > { %2503 = vmatpush3.bf16.msra.mxu1 %v2500_v27 }
 0x744   : > { %v1365_v10 = vmax.f32 %v1363_v23, %v1364_v30  ;;  %2505 = vmatprep.subr.bf16.mxu1 %v2504_v44 }
 0x746   : > { %v1366_v24 = vrot.slane %v1365_v10, 1 }
 0x747   : > { %2507 = vmatpush3.bf16.msra.mxu1 %v2504_v44 }
 0x748   : > { %v3718_v31 = vpop.eup %2703  ;;  %v1367_v3 = vmax.f32 %v1365_v10, %v1366_v24 }
 0x749   : > { %v1434_v50 = vsel %vm341_vm0, %v3718_v31, 0.0 }
 0x74a   : > { %1435 = vadd.xlane.f32.xlu0 %v1434_v50  ;;  %vm1369_vm5 = vcmp.gt.f32.partialorder %v1367_v3, %v3681_v47  ;;  %vm1368_vm6 = vcmp.gt.f32.partialorder %v1367_v3, %v3687_v63  ;;  %vm1370_vm4 = vcmp.gt.f32.partialorder %v1367_v3, %v1349_v59  ;;  %vm1371_vm3 = vcmp.gt.f32.partialorder %v1367_v3, %v3695_v39  ;;  %v1608_v39 = vld [vmem:[%s3203_s24 + $0x10] sm:$0xff] }
 0x74b   : > { %v2240_v47 = vsel %vm1369_vm5, 1.0, %v2930_v43  ;;  %v2239_v63 = vsel %vm1368_vm6, 1.0, %v2930_v43  ;;  %v2241_v60 = vsel %vm1370_vm4, 1.0, %v2930_v43  ;;  %v2242_v22 = vsel %vm1371_vm3, 1.0, %v2930_v43 }
 0x74c   : > { %v1383_v57 = vsel %vm341_vm0, %v2240_v47, 0.0  ;;  %v1380_v61 = vsel %vm341_vm0, %v2239_v63, 0.0  ;;  %v1386_v62 = vsel %vm341_vm0, %v2241_v60, 0.0  ;;  %v1389_v4 = vsel %vm341_vm0, %v2242_v22, 0.0 }
 0x753   : > { %2651 = vrot.lane.b32.xlu1 %v2650_v40, %s2934_s5 }
 0x757   : > { %1622 = vrot.lane.b32.xlu1 %v1606_v5, %s2934_s5 }
 0x75b   : > { %1624 = vrot.lane.b32.xlu1 %v1607_v36, %s2934_s5 }
 0x760   : > { %2646 = vrot.lane.b32.xlu0 %v2645_v45, %s2934_s5 }
 0x77f   : > { %1384 = vadd.xlane.f32.xlu1 %v1383_v57  ;;  %1381 = vadd.xlane.f32.xlu0 %v1380_v61 }
 0x783   : > { %1387 = vadd.xlane.f32.xlu1 %v1386_v62  ;;  %1390 = vadd.xlane.f32.xlu0 %v1389_v4 }
 0x794   : > { %1628 = vrot.lane.b32.xlu1 %v1609_v13, %s2934_s5 }
 0x799   : > { %1626 = vrot.lane.b32.xlu0 %v1608_v39, %s2934_s5 }
 0x7c3   : > { %v1433_v25 = vpop.xlane.xlu1 %1432 }
 0x7c4   : > { %2705 = vrcp.f32 %v1433_v25 }
 0x7cb   : > { %v1430_v59 = vpop.xlane.xlu0 %1429 }
 0x7cc   : > { %2707 = vrcp.f32 %v1430_v59 }
 0x7ce   : > { %v2706_v26 = vpop.eup %2705 }
 0x7cf   : > { %v1439_v8 = vpop.xlane.xlu1 %1438  ;;  %v1445_v44 = vmul.f32 %v2706_v26, %v1433_v25 }
 0x7d0   : > { %2709 = vrcp.f32 %v1439_v8 }
 0x7d1   : > { %v1449_v24 = vsub.f32 2.0, %v1445_v44 }
 0x7d3   : > { %v2652_v9 = vpop.permute.xlu1 %2651  ;;  %v1453_v21 = vmul.f32 %v2706_v26, %v1449_v24 }
 0x7d4   : > { %v2654_v46 = vunpack.i.h.bf16 %v2652_v9  ;;  %v2653_v45 = vunpack.i.l.bf16 %v2652_v9 }
 0x7d5   : > { %v1457_v47 = vmul.f32 %v3697_v48, %v1453_v21 }
 0x7d6   : > { %v2708_v23 = vpop.eup %2707  ;;  %v2514_v39 = vpack.c.bf16 %v2654_v46, %v2653_v45 }
 0x7d7   : > { %v1436_v17 = vpop.xlane.xlu0 %1435  ;;  %v1444_v29 = vmul.f32 %v2708_v23, %v1430_v59  ;;  %v1623_v10 = vpop.permute.xlu1 %1622 }
 0x7d8   : > { %2711 = vrcp.f32 %v1436_v17 }
 0x7d9   : > { %v1448_v3 = vsub.f32 2.0, %v1444_v29 }
 0x7da   : > { %v2710_v27 = vpop.eup %2709 }
 0x7db   : > { %v2647_v6 = vpop.permute.xlu0 %2646  ;;  %v1447_v50 = vmul.f32 %v2710_v27, %v1439_v8  ;;  %v1452_v40 = vmul.f32 %v2708_v23, %v1448_v3  ;;  %v1625_v20 = vpop.permute.xlu1 %1624 }
 0x7dc   : > { %v2649_v42 = vunpack.i.h.bf16 %v2647_v6  ;;  %v2648_v1 = vunpack.i.l.bf16 %v2647_v6 }
 0x7dd   : > { %v1451_v5 = vsub.f32 2.0, %v1447_v50  ;;  %v1456_v63 = vmul.f32 %v3710_v51, %v1452_v40 }
 0x7de   : > { %v2508_v2 = vpack.c.bf16 %v2649_v42, %v2648_v1 }
 0x7df   : > { %v1455_v57 = vmul.f32 %v2710_v27, %v1451_v5 }
 0x7e0   : > { %2510 = vmatprep.subr.msk.bf16.mxu1 %vm3222_vm1, %v2508_v2 }
 0x7e1   : > { %v1459_v13 = vmul.f32 %v3714_v37, %v1455_v57 }
 0x7e2   : > { %v2712_v30 = vpop.eup %2711 }
 0x7e3   : > { %v1446_v38 = vmul.f32 %v2712_v30, %v1436_v17 }
 0x7e5   : > { %v1450_v36 = vsub.f32 2.0, %v1446_v38 }
 0x7e7   : > { %v1454_v61 = vmul.f32 %v2712_v30, %v1450_v36 }
 0x7e9   : > { %v1458_v59 = vmul.f32 %v3718_v31, %v1454_v61 }
 0x80c   : > { %v1385_v60 = vpop.xlane.xlu1 %1384  ;;  %v1382_v22 = vpop.xlane.xlu0 %1381 }
 0x80d   : > { %vm1393_vm3 = vcmp.lt.f32.partialorder %v1385_v60, 20.0  ;;  %vm1392_vm5 = vcmp.lt.f32.partialorder %v1382_v22, 20.0 }
 0x80e   : > { %v1469_v62 = vsel %vm1393_vm3, %v1457_v47, %v3464_v52  ;;  %v1468_v4 = vsel %vm1392_vm5, %v1456_v63, %v3455_v15 }
 0x80f   : > { %2414 = vmatprep.mubr.msk.f32.mxu1 %vm341_vm0, %v1468_v4 }
 0x810   : > { %v1388_v48 = vpop.xlane.xlu1 %1387  ;;  %v1391_v17 = vpop.xlane.xlu0 %1390  ;;  %2415 = vmatmul.mubr.msk.f32.vlgmr.msra.gmra.mrb[8].mxu1 %vm341_vm0, %v1469_v62 }
 0x811   : > { %vm1394_vm6 = vcmp.lt.f32.partialorder %v1388_v48, 20.0  ;;  %vm1395_vm4 = vcmp.lt.f32.partialorder %v1391_v17, 20.0  ;;  %2513 = vmatpush3.bf16.xpose.msk.msra.mxu1 %vm3222_vm1, %v2508_v2 }
 0x812   : > { %v1470_v51 = vsel %vm1394_vm6, %v1458_v59, %v3469_v54  ;;  %v1471_v6 = vsel %vm1395_vm4, %v1459_v13, %v3484_v11  ;;  %2516 = vmatprep.subr.msk.bf16.mxu1 %vm3222_vm1, %v2514_v39 }
 0x813   : > { %2417 = vmatprep.mubr.msk.f32.mxu1 %vm341_vm0, %v1470_v51 }
 0x814   : > { %2418 = vmatmul.mubr.msk.f32.gmra.mrb[10].mxu1 %vm341_vm0, %v1471_v6  ;;  %v1627_v37 = vpop.permute.xlu0 %1626  ;;  %v1629_v31 = vpop.permute.xlu1 %1628 }
 0x815   : > { %2428 = vmatprep.mubr.msk.f32.mxu1 %vm341_vm0, %v1623_v10 }
 0x819   : > { %2519 = vmatpush3.bf16.xpose.msk.msra.mxu1 %vm3222_vm1, %v2514_v39  ;;  %vm4035_vm1 = vcmp.eq.s32.totalorder %v3275_v33, %v3329_v7 }
 0x820   : > { %2429 = vmatmul.mubr.msk.f32.vlgmr.msra.gmra.mrb[12].mxu1 %vm341_vm0, %v1625_v20 }
 0x821   : > { %2431 = vmatprep.mubr.msk.f32.mxu1 %vm341_vm0, %v1627_v37 }
 0x824   : > { %2432 = vmatmul.mubr.msk.f32.gmra.mrb[14].mxu1 %vm341_vm0, %v1629_v31 }
 0x8e3   : > { %v3771_v42 = vpop.f32.mrb[8].mxu1 }
 0x8e4   : > { %v3773_v1 = vpop.f32.mrb[9].mxu1 }
 0x8e7   : > { %v3775_v2 = vpop.f32.mrb[10].mxu1 }
 0x8e8   : > { %v3777_v25 = vpop.f32.mrb[11].mxu1 }
 0x8f3   : > { %v2430_v8 = vpop.f32.mrb[12].mxu1 }
 0x8f4   : > { %v1724_v26 = vpop.f32.mrb[13].mxu1  ;;  %v1760_v0 = vsel %vm3277_vm7, %v2430_v8, 0.0  ;;  %v1829_v9 = vmul.f32 0.17677669, %v2430_v8  ;;  %v1744_v53 = vsel %vm3277_vm7, %v2430_v8, -inf  ;;  %vm4036_vm7 = vcmp.eq.s32.totalorder %v3275_v33, %v3333_v12 }
 0x8f5   : > { %v1766_v23 = vsel %vm341_vm0, %v1760_v0, 0.0  ;;  %v1759_v27 = vsel %vm3281_vm8, %v1724_v26, 0.0  ;;  %v1828_v44 = vmul.f32 0.17677669, %v1724_v26  ;;  %v1750_v45 = vsel %vm341_vm0, %v1744_v53, -inf }
 0x8f6   : > { %1767 = vadd.xlane.f32.xlu1 %v1766_v23  ;;  %v1763_v29 = vsel %vm341_vm0, %v1759_v27, 0.0  ;;  %v1833_v30 = vsel %vm3289_vm9, -inf, %v1829_v9  ;;  %v1743_v16 = vsel %vm3281_vm8, %v1724_v26, -inf }
 0x8f7   : > { %1764 = vadd.xlane.f32.xlu0 %v1763_v29  ;;  %v2433_v10 = vpop.f32.mrb[14].mxu1  ;;  %v1832_v24 = vsel %vm3303_vm10, -inf, %v1828_v44  ;;  %v1839_v38 = vsel %vm341_vm0, %v1833_v30, -inf  ;;  %v1747_v60 = vsel %vm341_vm0, %v1743_v16, -inf }
 0x8f8   : > { %v1734_v3 = vpop.f32.mrb[15].mxu1  ;;  %v1762_v50 = vsel %vm3308_vm11, %v2433_v10, 0.0  ;;  %v1836_v40 = vsel %vm341_vm0, %v1832_v24, -inf  ;;  %v1831_v5 = vmul.f32 0.17677669, %v2433_v10  ;;  %v1746_v63 = vsel %vm3308_vm11, %v2433_v10, -inf }
 0x8f9   : > { %v1761_v21 = vsel %vm3315_vm12, %v1734_v3, 0.0  ;;  %v1772_v41 = vsel %vm341_vm0, %v1762_v50, 0.0  ;;  %v1830_v20 = vmul.f32 0.17677669, %v1734_v3  ;;  %v1756_v34 = vsel %vm341_vm0, %v1746_v63, -inf }
 0x8fa   : > { %1840 = vmax.xlane.f32.xlu1 %v1839_v38  ;;  %v1769_v36 = vsel %vm341_vm0, %v1761_v21, 0.0  ;;  %v1835_v46 = vsel %vm3341_vm13, -inf, %v1831_v5  ;;  %v1745_v55 = vsel %vm3315_vm12, %v1734_v3, -inf  ;;  %vm1169_vm13 = vcmask 523520  }
 0x8fb   : > { %1837 = vmax.xlane.f32.xlu0 %v1836_v40  ;;  %v1845_v47 = vsel %vm341_vm0, %v1835_v46, -inf  ;;  %v1834_v57 = vsel %vm3347_vm14, -inf, %v1830_v20  ;;  %v1753_v22 = vsel %vm341_vm0, %v1745_v55, -inf  ;;  %vm1601_vm14 = vcmask 785920  }
 0x8fc   : > { %v1842_v61 = vsel %vm341_vm0, %v1834_v57, -inf }
 0x8fe   : > { %1773 = vadd.xlane.f32.xlu1 %v1772_v41 }
 0x8ff   : > { %1770 = vadd.xlane.f32.xlu0 %v1769_v36 }
 0x902   : > { %1751 = vmax.xlane.f32.xlu1 %v1750_v45 }
 0x903   : > { %1846 = vmax.xlane.f32.xlu0 %v1845_v47 }
 0x906   : > { %1757 = vmax.xlane.f32.xlu1 %v1756_v34 }
 0x907   : > { %1843 = vmax.xlane.f32.xlu0 %v1842_v61 }
 0x90b   : > { %1748 = vmax.xlane.f32.xlu0 %v1747_v60 }
 0x90f   : > { %1754 = vmax.xlane.f32.xlu0 %v1753_v22 }
 0x983   : > { %v1768_v18 = vpop.xlane.xlu1 %1767 }
 0x984   : > { %v1765_v62 = vpop.xlane.xlu0 %1764  ;;  %v1776_v9 = vmul.f32 0.03125, %v1768_v18 }
 0x985   : > { %v1775_v44 = vmul.f32 0.03125, %v1765_v62 }
 0x987   : > { %v1841_v4 = vpop.xlane.xlu1 %1840 }
 0x988   : > { %v1849_v13 = vsub.f32 %v1833_v30, %v1841_v4  ;;  %v1838_v39 = vpop.xlane.xlu0 %1837 }
 0x989   : > { %v1848_v59 = vsub.f32 %v1832_v24, %v1838_v39 }
 0x98a   : > { %v1854_v48 = vmul.f32 1.442695, %v1849_v13 }
 0x98b   : > { %v1852_v17 = vmul.f32 1.442695, %v1848_v59  ;;  %v1774_v51 = vpop.xlane.xlu1 %1773 }
 0x98c   : > { %2713 = vpow2.f32 %v1854_v48  ;;  %v1771_v35 = vpop.xlane.xlu0 %1770  ;;  %v1778_v29 = vmul.f32 0.03125, %v1774_v51 }
 0x98d   : > { %2715 = vpow2.f32 %v1852_v17  ;;  %v1777_v40 = vmul.f32 0.03125, %v1771_v35 }
 0x98f   : > { %v1752_v6 = vpop.xlane.xlu1 %1751 }
 0x990   : > { %v1847_v37 = vpop.xlane.xlu0 %1846  ;;  %v1780_v50 = vsub.f32 %v1752_v6, %v1776_v9  ;;  %v1616_v6 = vld [vmem:[%s3214_s19 + $0x10] sm:$0xff] }
 0x991   : > { %v1851_v31 = vsub.f32 %v1835_v46, %v1847_v37  ;;  %v1617_v37 = vld [vmem:[%s3214_s19 + $0x18] sm:$0xff] }
 0x992   : > { %v1784_v36 = vsel %vm322_vm2, %v1780_v50, -inf }
 0x993   : > { %v1858_v58 = vmul.f32 1.442695, %v1851_v31  ;;  %v1758_v23 = vpop.xlane.xlu1 %1757  ;;  %v1788_v28 = vsel %vm341_vm0, %v1784_v36, -inf  ;;  %v2660_v31 = vpack.i.bf16 %v1617_v37, %v1616_v6 }
 0x994   : > { %v1844_v8 = vpop.xlane.xlu0 %1843  ;;  %v1782_v38 = vsub.f32 %v1758_v23, %v1778_v29 }
 0x995   : > { %2717 = vpow2.f32 %v1858_v58  ;;  %v1850_v26 = vsub.f32 %v1834_v57, %v1844_v8  ;;  %v1614_v58 = vld [vmem:[%s3214_s19] sm:$0xff]  ;;  %v1615_v8 = vld [vmem:[%s3214_s19 + $0x8] sm:$0xff] }
 0x996   : > { %v3815_v0 = vpop.eup %2713  ;;  %v1786_v53 = vsel %vm4035_vm1, %v1782_v38, -inf }
 0x997   : > { %v3817_v27 = vpop.eup %2715  ;;  %v1856_v30 = vmul.f32 1.442695, %v1850_v26  ;;  %v1863_v10 = vsel %vm341_vm0, %v3815_v0, 0.0  ;;  %v1790_v63 = vsel %vm341_vm0, %v1786_v53, -inf  ;;  %v2655_v26 = vpack.i.bf16 %v1615_v8, %v1614_v58 }
 0x998   : > { %1864 = vadd.xlane.f32.xlu1 %v1863_v10  ;;  %v1749_v24 = vpop.xlane.xlu0 %1748  ;;  %v1860_v3 = vsel %vm341_vm0, %v3817_v27, 0.0 }
 0x999   : > { %2719 = vpow2.f32 %v1856_v30  ;;  %v1779_v21 = vsub.f32 %v1749_v24, %v1775_v44  ;;  %1861 = vadd.xlane.f32.xlu0 %v1860_v3 }
 0x99b   : > { %v1783_v41 = vsel %vm321_vm15, %v1779_v21, -inf }
 0x99c   : > { %v1755_v5 = vpop.xlane.xlu0 %1754  ;;  %v1787_v46 = vsel %vm341_vm0, %v1783_v41, -inf }
 0x99d   : > { %v1781_v20 = vsub.f32 %v1755_v5, %v1777_v40  ;;  %v1791_v7 = vmax.f32 %v1787_v46, %v1788_v28 }
 0x99f   : > { %v3833_v45 = vpop.eup %2717  ;;  %v1785_v47 = vsel %vm4036_vm7, %v1781_v20, -inf }
 0x9a0   : > { %v1789_v32 = vsel %vm341_vm0, %v1785_v47, -inf  ;;  %v1869_v57 = vsel %vm341_vm0, %v3833_v45, 0.0 }
 0x9a1   : > { %v1792_v34 = vmax.f32 %v1789_v32, %v1790_v63  ;;  %1870 = vadd.xlane.f32.xlu1 %v1869_v57 }
 0x9a3   : > { %v3843_v61 = vpop.eup %2719  ;;  %v1793_v16 = vmax.f32 %v1791_v7, %v1792_v34 }
 0x9a4   : > { %v1866_v60 = vsel %vm341_vm0, %v3843_v61, 0.0 }
 0x9a5   : > { %v1794_v33 = vrot.slane %v1793_v16, 4  ;;  %1867 = vadd.xlane.f32.xlu0 %v1866_v60 }
 0x9a7   : > { %v1795_v12 = vmax.f32 %v1793_v16, %v1794_v33 }
 0x9a9   : > { %v1796_v55 = vrot.slane %v1795_v12, 2 }
 0x9ab   : > { %v1797_v22 = vmax.f32 %v1795_v12, %v1796_v55 }
 0x9ad   : > { %v1798_v18 = vrot.slane %v1797_v22, 1 }
 0x9af   : > { %v1799_v62 = vmax.f32 %v1797_v22, %v1798_v18 }
 0x9b1   : > { %vm1802_vm8 = vcmp.gt.f32.partialorder %v1799_v62, %v1781_v20  ;;  %vm1801_vm9 = vcmp.gt.f32.partialorder %v1799_v62, %v1780_v50  ;;  %vm1800_vm10 = vcmp.gt.f32.partialorder %v1799_v62, %v1779_v21  ;;  %vm1803_vm11 = vcmp.gt.f32.partialorder %v1799_v62, %v1782_v38 }
 0x9b2   : > { %v2256_v4 = vsel %vm1801_vm9, 1.0, %v2930_v43  ;;  %v2255_v13 = vsel %vm1800_vm10, 1.0, %v2930_v43  ;;  %v2258_v48 = vsel %vm1803_vm11, 1.0, %v2930_v43  ;;  %v2257_v17 = vsel %vm1802_vm8, 1.0, %v2930_v43 }
 0x9b3   : > { %v1815_v39 = vsel %vm341_vm0, %v2256_v4, 0.0  ;;  %v1812_v59 = vsel %vm341_vm0, %v2255_v13, 0.0  ;;  %v1821_v51 = vsel %vm341_vm0, %v2258_v48, 0.0  ;;  %v1818_v35 = vsel %vm341_vm0, %v2257_v17, 0.0 }
 0x9b4   : > { %1816 = vadd.xlane.f32.xlu1 %v1815_v39  ;;  %1813 = vadd.xlane.f32.xlu0 %v1812_v59 }
 0x9b8   : > { %1822 = vadd.xlane.f32.xlu1 %v1821_v51  ;;  %1819 = vadd.xlane.f32.xlu0 %v1818_v35 }
 0x9c9   : > { %2661 = vrot.lane.b32.xlu1 %v2660_v31, %s2934_s5 }
 0x9cd   : > { %1157 = vrot.lane.b32.xlu1 %v3635_v56, %s2934_s5 }
 0x9ce   : > { %2656 = vrot.lane.b32.xlu0 %v2655_v26, %s2934_s5 }
 0x9d1   : > { %1159 = vrot.lane.b32.xlu1 %v3633_v49, %s2934_s5 }
 0x9d2   : > { %1161 = vrot.lane.b32.xlu0 %v3639_v14, %s2934_s5 }
 0x9d5   : > { %1163 = vrot.lane.b32.xlu1 %v3637_v19, %s2934_s5 }
 0x9d6   : > { %1589 = vrot.lane.b32.xlu0 %v3773_v1, %s2933_s7 }
 0x9d9   : > { %1591 = vrot.lane.b32.xlu1 %v3771_v42, %s2933_s7 }
 0x9da   : > { %1593 = vrot.lane.b32.xlu0 %v3777_v25, %s2933_s7 }
 0x9dd   : > { %1595 = vrot.lane.b32.xlu1 %v3775_v2, %s2933_s7 }
 0xa25   : > { %v1865_v9 = vpop.xlane.xlu1 %1864 }
 0xa26   : > { %v1862_v43 = vpop.xlane.xlu0 %1861 }
 0xa27   : > { %2721 = vrcp.f32 %v1862_v43 }
 0xa2e   : > { %v1871_v23 = vpop.xlane.xlu1 %1870 }
 0xa31   : > { %v2722_v49 = vpop.eup %2721 }
 0xa32   : > { %v1876_v56 = vmul.f32 %v2722_v49, %v1862_v43  ;;  %v1868_v14 = vpop.xlane.xlu0 %1867 }
 0xa33   : > { %2723 = vrcp.f32 %v1868_v14 }
 0xa34   : > { %v1880_v19 = vsub.f32 2.0, %v1876_v56  ;;  %2725 = vrcp.f32 %v1865_v9 }
 0xa35   : > { %2727 = vrcp.f32 %v1871_v23 }
 0xa36   : > { %v1884_v1 = vmul.f32 %v2722_v49, %v1880_v19 }
 0xa38   : > { %v1888_v42 = vmul.f32 %v3817_v27, %v1884_v1 }
 0xa3d   : > { %v2724_v25 = vpop.eup %2723 }
 0xa3e   : > { %v2726_v30 = vpop.eup %2725  ;;  %v1878_v10 = vmul.f32 %v2724_v25, %v1868_v14 }
 0xa3f   : > { %v1877_v50 = vmul.f32 %v2726_v30, %v1865_v9  ;;  %v2728_v38 = vpop.eup %2727 }
 0xa40   : > { %v1882_v21 = vsub.f32 2.0, %v1878_v10  ;;  %v1879_v46 = vmul.f32 %v2728_v38, %v1871_v23 }
 0xa41   : > { %v1817_v44 = vpop.xlane.xlu1 %1816  ;;  %v1814_v29 = vpop.xlane.xlu0 %1813  ;;  %v1881_v20 = vsub.f32 2.0, %v1877_v50 }
 0xa42   : > { %vm1824_vm12 = vcmp.lt.f32.partialorder %v1814_v29, 20.0  ;;  %v1886_v32 = vmul.f32 %v2724_v25, %v1882_v21  ;;  %v1883_v7 = vsub.f32 2.0, %v1879_v46  ;;  %vm1825_vm15 = vcmp.lt.f32.partialorder %v1817_v44, 20.0 }
 0xa43   : > { %v1900_v2 = vsel %vm1824_vm12, %v1888_v42, %v3455_v15  ;;  %v1885_v57 = vmul.f32 %v2726_v30, %v1881_v20 }
 0xa44   : > { %2442 = vmatprep.mubr.msk.f32.mxu0 %vm341_vm0, %v1900_v2  ;;  %v1890_v60 = vmul.f32 %v3843_v61, %v1886_v32  ;;  %v1887_v12 = vmul.f32 %v2728_v38, %v1883_v7 }
 0xa45   : > { %v1823_v24 = vpop.xlane.xlu1 %1822  ;;  %v1820_v3 = vpop.xlane.xlu0 %1819  ;;  %v1889_v33 = vmul.f32 %v3815_v0, %v1885_v57 }
 0xa46   : > { %vm1826_vm2 = vcmp.lt.f32.partialorder %v1820_v3, 20.0  ;;  %vm1827_vm3 = vcmp.lt.f32.partialorder %v1823_v24, 20.0  ;;  %v1891_v0 = vmul.f32 %v3833_v45, %v1887_v12 }
 0xa47   : > { %v1901_v55 = vsel %vm1825_vm15, %v1889_v33, %v3464_v52  ;;  %v1902_v62 = vsel %vm1826_vm2, %v1890_v60, %v3469_v54 }
 0xa48   : > { %v1903_v61 = vsel %vm1827_vm3, %v1891_v0, %v3484_v11 }
 0xa49   : > { %v2662_v40 = vpop.permute.xlu1 %2661  ;;  %v2657_v41 = vpop.permute.xlu0 %2656 }
 0xa4a   : > { %v2664_v27 = vunpack.i.h.bf16 %v2662_v40  ;;  %v2663_v5 = vunpack.i.l.bf16 %v2662_v40  ;;  %v2659_v36 = vunpack.i.h.bf16 %v2657_v41  ;;  %v2658_v53 = vunpack.i.l.bf16 %v2657_v41 }
 0xa4c   : > { %v2524_v15 = vpack.c.bf16 %v2664_v27, %v2663_v5  ;;  %v2520_v47 = vpack.c.bf16 %v2659_v36, %v2658_v53 }
 0xa4d   : > { %v1158_v28 = vpop.permute.xlu1 %1157  ;;  %v1162_v63 = vpop.permute.xlu0 %1161 }
 0xa4e   : > { %1170 = vst.msk [vmem:[%s3494_s22] sm:$0xff] %vm1169_vm13, %v1158_v28  ;;  %1172 = vst.msk [vmem:[%s3494_s22 + $0x10] sm:$0xff] %vm1169_vm13, %v1162_v63  ;;  %2521 = vmatprep.subr.bf16.mxu0 %v2520_v47 }
 0xa4f   : > { %2523 = vmatpush3.bf16.msra.mxu0 %v2520_v47 }
 0xa50   : > { %2525 = vmatprep.subr.bf16.mxu0 %v2524_v15 }
 0xa51   : > { %v1160_v34 = vpop.permute.xlu1 %1159  ;;  %v1590_v16 = vpop.permute.xlu0 %1589 }
 0xa52   : > { %1171 = vst.msk [vmem:[%s3494_s22 + $0x8] sm:$0xff] %vm1169_vm13, %v1160_v34 }
 0xa53   : > { %1602 = vst.msk [vmem:[%s3494_s22] sm:$0xff] %vm1601_vm14, %v1590_v16  ;;  %2527 = vmatpush3.bf16.msra.mxu0 %v2524_v15 }
 0xa55   : > { %v1164_v22 = vpop.permute.xlu1 %1163  ;;  %v1594_v18 = vpop.permute.xlu0 %1593 }
 0xa56   : > { %1173 = vst.msk [vmem:[%s3494_s22 + $0x18] sm:$0xff] %vm1169_vm13, %v1164_v22  ;;  %2443 = vmatmul.mubr.msk.f32.vlgmr.msra.gmra.mrb[12].mxu0 %vm341_vm0, %v1901_v55 }
 0xa57   : > { %1604 = vst.msk [vmem:[%s3494_s22 + $0x10] sm:$0xff] %vm1601_vm14, %v1594_v18  ;;  %2445 = vmatprep.mubr.msk.f32.mxu0 %vm341_vm0, %v1902_v62 }
 0xa59   : > { %v1592_v4 = vpop.permute.xlu1 %1591 }
 0xa5a   : > { %1603 = vst.msk [vmem:[%s3494_s22 + $0x8] sm:$0xff] %vm1601_vm14, %v1592_v4  ;;  %2446 = vmatmul.mubr.msk.f32.gmra.mrb[14].mxu0 %vm341_vm0, %v1903_v61  ;;  %vm2033_vm0 = vcmask 1048320  }
 0xa5d   : > { %v1596_v52 = vpop.permute.xlu1 %1595 }
 0xa5e   : > { %1605 = vst.msk [vmem:[%s3494_s22 + $0x18] sm:$0xff] %vm1601_vm14, %v1596_v52 }
 0xb29   : > { %v2444_v54 = vpop.f32.mrb[12].mxu0 }
 0xb2a   : > { %2023 = vrot.lane.b32.xlu1 %v2444_v54, %s2931_s11  ;;  %v1998_v45 = vpop.f32.mrb[13].mxu0 }
 0xb2b   : > { %2021 = vrot.lane.b32.xlu0 %v1998_v45, %s2931_s11 }
 0xb2d   : > { %v2447_v11 = vpop.f32.mrb[14].mxu0 }
 0xb2e   : > { %2027 = vrot.lane.b32.xlu1 %v2447_v11, %s2931_s11  ;;  %v2008_v13 = vpop.f32.mrb[15].mxu0 }
 0xb2f   : > { %2025 = vrot.lane.b32.xlu0 %v2008_v13, %s2931_s11 }
 0xb9c   : > { %v2024_v39 = vpop.permute.xlu1 %2023 }
 0xb9d   : > { %2035 = vst.msk [vmem:[%s3494_s22 + $0x8] sm:$0xff] %vm2033_vm0, %v2024_v39  ;;  %v2022_v59 = vpop.permute.xlu0 %2021 }
 0xb9e   : > { %2034 = vst.msk [vmem:[%s3494_s22] sm:$0xff] %vm2033_vm0, %v2022_v59 }
 0xba0   : > { %v2028_v48 = vpop.permute.xlu1 %2027 }
 0xba1   : > { %2037 = vst.msk [vmem:[%s3494_s22 + $0x18] sm:$0xff] %vm2033_vm0, %v2028_v48  ;;  %v2026_v17 = vpop.permute.xlu0 %2025 }
 0xba2   : > { %2036 = vst.msk [vmem:[%s3494_s22 + $0x10] sm:$0xff] %vm2033_vm0, %v2026_v17 }
 0xba3   : > { %2860 = shalt.err (!%p2857_p3)
}
 0xba4   : > { %s2861_s1 = scalar_lea.hbm %s3916_s20, 512  ;;  %s2865_s18 = scalar_lea.hbm %s3968_s4, 1024 }
 0xba5   : > { %p2862_p1 = scmp.ne.s32.totalorder %s3916_s20, %s2861_s1  ;;  %p2866_p7 = scmp.lt.u32.totalorder %s3916_s20, %s3968_s4 }
 0xba6   : > { %p2867_p11 = scmp.lt.u32.totalorder %s2865_s18, %s2861_s1  ;;  %p2869_p2 = scmp.lt.u32.totalorder %s2861_s1, %s3916_s20 }
 0xba7   : > { %p2863_p5 = pnand %p2862_p1, %p4037_p12 }
 0xba8   : > { %p2868_p0 = por %p2867_p11, %p2866_p7 }
 0xba9   : > { %p2864_p8 = pneg %p2863_p5 }
 0xbaa   : > { %p2870_p10 = por %p2869_p2, %p2868_p0 }
 0xbac   : > { %p2871_p13 = pnand %p2870_p10, %p2864_p8 }
 0xbae   : > { %2874 = shalt.err (!%p2871_p13)
}
 0xbaf   : > { %s2936_s12 = smov 128   ;;  %s2937_s28 = smov 8  }
 0xbb0   : > { %2538 = dma.vmem_to_hbm [thread:$0]  (%p4037_p12), %s3918_s10, 512, %s3916_s20, %s2039_s27, %s2936_s12, %s2936_s12, %s2937_s28  }
 0xbb1 PF: > { %s4038_s19 = sld [smem:[#allocation18_spill]]  ;;  %s4039_s11 = sld [smem:[#allocation15_spill]] }
 0xbb2   : > { %s2067_s22 = sand.u32 1, %s2909_s15  }
 0xbb3   : > { %s2068_s7 = scalar_lea.sflag [#allocation4], %s2067_s22 }
 0xbb7   : > { %p4040_p4 = scmp.ne.s32.totalorder %s4038_s19, 0  ;;  %p4041_p9 = scmp.ge.s32.totalorder %s4039_s11, 2 }
 0xbb9   : > { %p2555_p6 = pnand %p4041_p9, %p4040_p4 }
 0xbbb   : > { %2904 = dma.done.wait (!%p2555_p6), %s2068_s7, 512  }
 0xbbc   : > { %2906 = vsyncadd (!%p2555_p6), %s2068_s7, 4294966784  ;;  %s4042_s18 = sld [smem:[#allocation16_spill]]  ;;  %s4043_s5 = sld [smem:[#allocation17_spill]] }
 0xbbd   : > { %s4044_s15 = smov %s2913_s16  ;;  %s4045_s16 = smov %s2917_s17 }
 0xbc2   : > { %p21_p3 = scmp.ge.s32.totalorder %s4042_s18, 4   ;;  %s4046_s17 = smov %s4043_s5 }
 0xbc4   :  { %23 = sbr.rel (!%p21_p3) target bundleno = 11 (0xb), region = 110 }
 0xbcb   :  { %2073 = vsyncpa [#allocation3], 1 }
 0xbcc   :  { %2075 = vsyncpa [#allocation3 + $0x1], 1 }
 0xbcd   :  { %2076 = vsyncpa [#allocation6], 1 }
 0xbce   :  { %2078 = vsyncpa [#allocation6 + $0x1], 1 }
 0xbcf   :  { %2079 = vsyncpa [#allocation9], 1 }
 0xbd0   :  { %2081 = vsyncpa [#allocation9 + $0x1], 1 }
 0xbd1   :  { %2082 = vsyncpa [#allocation4], 1 }
 0xbd2   :  { %2084 = vsyncpa [#allocation4 + $0x1], 1 }

</bundles_post_ra>
